<compile_context>
chip_gen: v6e
topology: v6e:2x2x1
jax: 0.10.0
libtpu: 0.0.40
codegen_flags: <defaults>
</compile_context>

<pallas_src>
import numpy as np
import jax
import jax.numpy as jnp
from jax import lax
from jax.experimental import pallas as pl
from jax.experimental.pallas import tpu as pltpu


CP = 8          # padded channel count = one sublane tile
ONES_X0 = 6     # pad-channel slot of x0 that carries a constant 1 (bias carrier)
ONES_X1 = 7     # pad-channel slot of x1 that carries a constant 1 (bias carrier)


# ----------------------------------------------------------------------------
# Host-side constant operators / weight packing (static shapes only).
# ----------------------------------------------------------------------------
def _bilinear_matrix_np(out_size, in_size):
    """PyTorch F.interpolate(mode='bilinear', align_corners=False) row operator."""
    m = np.zeros((out_size, in_size), np.float32)
    scale = in_size / out_size
    for i in range(out_size):
        src = (i + 0.5) * scale - 0.5
        src = max(src, 0.0)
        i0 = min(int(np.floor(src)), in_size - 1)
        i1 = min(i0 + 1, in_size - 1)
        f = src - i0
        m[i, i0] += 1.0 - f
        m[i, i1] += f
    return m


def resize_operator_blockdiag(H, W, h0, w0, N):
    """(N*h0*w0, N*H*W) block-diagonal operator: x_flat(C, N*h0w0) @ B = x_resized(C, N*HW)."""
    Rh = _bilinear_matrix_np(H, h0)                       # (H, h0)
    Rw = _bilinear_matrix_np(W, w0)                       # (W, w0)
    R = np.einsum('Hh,Ww->hwHW', Rh, Rw).reshape(h0 * w0, H * W)
    # TODO(synk): at production resolutions use a separable (Rh, Rw) two-matmul resize and
    # an HW-tiled grid instead of this dense per-batch Kronecker operator.
    return jnp.asarray(np.kron(np.eye(N, dtype=np.float32), R))


def border_masks(H, W, N):
    """(9, 1, N*H*W) 0/1 masks: tap t=ky*3+kx is valid where the 3x3 (pad=1) source pixel
    (y+ky-1, x+kx-1) is inside the image (also kills batch-boundary roll wrap-around)."""
    HW = H * W
    yy, xx = np.meshgrid(np.arange(H), np.arange(W), indexing='ij')
    m = np.zeros((9, 1, N * HW), np.float32)
    for ky in range(3):
        for kx in range(3):
            dy, dx = ky - 1, kx - 1
            valid = ((yy + dy >= 0) & (yy + dy < H) &
                     (xx + dx >= 0) & (xx + dx < W)).astype(np.float32).reshape(-1)
            m[ky * 3 + kx, 0] = np.tile(valid, N)
    return jnp.asarray(m)


def _pack_input(x, ones_row):
    """(N, C, h, w) -> (CP, N*h*w): channels on sublanes (padded to 8), batch folded into
    lanes.  One pad channel is set to a constant 1 to carry the folded conv biases."""
    n, c, h, w = x.shape
    xt = jnp.transpose(x, (1, 0, 2, 3)).reshape(c, n * h * w)
    xt = jnp.concatenate([xt, jnp.zeros((CP - c, n * h * w), xt.dtype)], axis=0)
    return xt.at[ones_row].set(1.0)


def _pack_conv3x3(w, b, C, bias_col, groups):
    """Conv weight (C, groups*C, 3, 3) + bias (C,) -> (9*CP, groups*CP) matmul LHS.

    Row t*CP + co holds the 1x1 weights of output channel co for tap t (t = ky*3+kx);
    the bias rides on column `bias_col` (a constant-one pad channel) of the centre tap."""
    wt = jnp.transpose(w, (2, 3, 0, 1)).reshape(9, C, groups * C)      # (tap, cout, cin)
    blk = jnp.zeros((9, CP, groups * CP), jnp.float32)
    for g in range(groups):
        blk = blk.at[:, :C, g * CP:g * CP + C].set(wt[:, :, g * C:(g + 1) * C])
    blk = blk.at[4, :C, bias_col].set(b)                               # centre tap
    return blk.reshape(9 * CP, groups * CP)


def _pack_sup(wsup, bsup, C):
    """1x1 sup conv (1, C, 1, 1) + bias -> (1, CP), bias on the x0 ones channel."""
    row = jnp.zeros((1, CP), jnp.float32)
    row = row.at[0, :C].set(wsup.reshape(-1))
    return row.at[0, ONES_X0].set(bsup[0])


# ----------------------------------------------------------------------------
# Fused info_block kernel.
# ----------------------------------------------------------------------------
def make_info_block_call(N, C, H, W, h0, w0):
    HW, hw0 = H * W, h0 * w0
    L = N * HW                      # lane axis: batch folded into spatial

    def kernel(x0_ref, x1_ref, rop_ref, masks_ref, w1_ref, wsup_ref, wf_ref,
               out_ref, sup_ref):
        x0p = x0_ref[...]                                              # (CP, N*hw0)
        x1p = x1_ref[...]                                              # (CP, L)

        # Bilinear resize of x0 to (H, W): one MXU matmul against the block-diagonal
        # interpolation operator (DEFAULT precision = single bf16 pass, f32 accumulate).
        x0r = jnp.dot(x0p, rop_ref[...], preferred_element_type=jnp.float32)   # (CP, L)

        def sigmoid(a):
            return pl.reciprocal(1.0 + jnp.exp(-a), approx=True)

        def conv3x3(y_taps):
            # y_taps: (9*CP, L) tap-major stack of per-tap 1x1-conv outputs (bias already
            # folded into the centre tap).  A 3x3 / pad=1 conv is then the sum over taps
            # of each tap output shifted by -(dy*W+dx) lanes, with zero padding applied
            # as a precomputed border mask (wrap-around across image/batch edges is
            # masked to zero, so the modular lane roll is safe).
            acc = jnp.zeros((CP, L), jnp.float32)
            for ky in range(3):
                for kx in range(3):
                    t = ky * 3 + kx
                    dy, dx = ky - 1, kx - 1
                    yt = y_taps[t * CP:(t + 1) * CP, :]
                    s = dy * W + dx
                    if s != 0:                                          # centre tap: no-op
                        yt = pltpu.roll(yt, (-s) % L, axis=1) * masks_ref[t]
                    acc = acc + yt
            return acc

        # res_conv1: 3x3 conv (pad=1) of (x0r - x1), then sigmoid.  Single fused tap
        # matmul: (9*CP, CP) @ (CP, L); bias via the constant-one pad channel.
        y1 = jnp.dot(w1_ref[...], x0r - x1p, preferred_element_type=jnp.float32)
        res_x1 = sigmoid(conv3x3(y1))                                   # (CP, L)

        # sup: 1x1 conv of resized x0 (bias folded via the ones channel).
        sup = jnp.dot(wsup_ref[...], x0r, preferred_element_type=jnp.float32)   # (1, L)
        sup_ref[...] = sup
        res_x0 = sigmoid(sup)

        # fuse: 3x3 conv (pad=1) over cat([x0r*res_x1, x1, x1*res_x0], channel dim).
        # 8-aligned in-register concat, then one fused (9*CP, 3*CP) @ (3*CP, L) matmul.
        cat = jnp.concatenate([x0r * res_x1, x1p, x1p * res_x0], axis=0)        # (3CP, L)
        yf = jnp.dot(wf_ref[...], cat, preferred_element_type=jnp.float32)      # (9CP, L)
        out_ref[...] = conv3x3(yf)[:C, :]

    def full(shape):
        n = len(shape)
        return pl.BlockSpec(shape, lambda i: (0,) * n)

    return pl.pallas_call(
        kernel,
        out_shape=(jax.ShapeDtypeStruct((C, L), jnp.float32),
                   jax.ShapeDtypeStruct((1, L), jnp.float32)),
        grid=(1,),                               # batch folded into lanes: single step
        in_specs=[
            full((CP, N * hw0)),                 # x0 (padded channels, lane-folded batch)
            full((CP, L)),                       # x1
            full((N * hw0, L)),                  # block-diag bilinear resize operator
            full((9, 1, L)),                     # 3x3 border masks (one lane row per tap)
            full((9 * CP, CP)),                  # res_conv1 tap weights (+bias)
            full((1, CP)),                       # sup 1x1 weights (+bias)
            full((9 * CP, 3 * CP)),              # fuse tap weights (+bias)
        ],
        out_specs=(full((C, L)), full((1, L))),
        compiler_params=pltpu.CompilerParams(
            dimension_semantics=("arbitrary",)),
    )


# ----------------------------------------------------------------------------
# Python wrapper: layout plumbing (transposes / padding / weight packing).
# ----------------------------------------------------------------------------
def info_block_forward(params, x0, x1, fdm):
    # fdm is interpolated in the PyTorch forward but the result is dead (never used in any
    # returned value), so it is intentionally not computed here.
    del fdm
    N, C, H, W = x1.shape
    _, _, h0, w0 = x0.shape
    assert C <= 6, "channel-padding scheme reserves pad slots 6/7 as bias carriers"
    # TODO(synk): for C > 6, round the padded channel count up to the next multiple of 8
    # that leaves two spare slots.

    x0p = _pack_input(x0, ONES_X0)                                     # (CP, N*h0*w0)
    x1p = _pack_input(x1, ONES_X1)                                     # (CP, N*H*W)
    rop = resize_operator_blockdiag(H, W, h0, w0, N)
    masks = border_masks(H, W, N)
    w1s = _pack_conv3x3(params['w1'], params['b1'], C, bias_col=ONES_X0, groups=1)
    wfs = _pack_conv3x3(params['wf'], params['bf'], C, bias_col=CP + ONES_X1, groups=3)
    wsupp = _pack_sup(params['wsup'], params['bsup'], C)

    outf, supf = make_info_block_call(N, C, H, W, h0, w0)(
        x0p, x1p, rop, masks, w1s, wsupp, wfs)

    out = jnp.transpose(outf.reshape(C, N, H, W), (1, 0, 2, 3))
    sup = jnp.transpose(supf.reshape(1, N, H, W), (1, 0, 2, 3))
    return out, sup, None


# ----------------------------------------------------------------------------
# Pure-JAX reference (for correctness check).
# ----------------------------------------------------------------------------
def ref_forward(params, x0, x1):
    N, C, H, W = x1.shape
    Rh = jnp.asarray(_bilinear_matrix_np(H, x0.shape[2]))
    Rw = jnp.asarray(_bilinear_matrix_np(W, x0.shape[3]))
    x0r = jnp.einsum('Hh,nchw,Ww->ncHW', Rh, x0, Rw,
                     precision=lax.Precision.HIGHEST)

    def conv(x, w, b, p):
        dn = lax.conv_dimension_numbers(x.shape, w.shape, ('NCHW', 'OIHW', 'NCHW'))
        y = lax.conv_general_dilated(x, w, (1, 1), [(p, p), (p, p)],
                                     dimension_numbers=dn,
                                     precision=lax.Precision.HIGHEST)
        return y + b[None, :, None, None]

    res_x1 = jax.nn.sigmoid(conv(x0r - x1, params['w1'], params['b1'], 1))
    sup = conv(x0r, params['wsup'], params['bsup'], 0)
    res_x0 = jax.nn.sigmoid(sup)
    out = conv(jnp.concatenate([x0r * res_x1, x1, x1 * res_x0], axis=1),
               params['wf'], params['bf'], 1)
    return out, sup


if __name__ == "__main__":
    N, C = 2, 4            # batch, feat
    H, W = 16, 16          # x1 spatial size
    h0, w0 = 8, 8          # x0 / fdm spatial size (upsampled to H, W)

    key = jax.random.PRNGKey(0)
    k0, k1, k2 = jax.random.split(key, 3)
    x0 = jax.random.normal(k0, (N, C, h0, w0), jnp.float32)
    x1 = jax.random.normal(k1, (N, C, H, W), jnp.float32)
    fdm = jax.random.normal(k2, (N, 1, h0, w0), jnp.float32)

    pk = jax.random.PRNGKey(1)
    ks = jax.random.split(pk, 6)
    params = {
        'w1':   jax.random.normal(ks[0], (C, C, 3, 3), jnp.float32) * 0.2,      # res_conv1
        'b1':   jax.random.normal(ks[1], (C,), jnp.float32) * 0.1,
        'wf':   jax.random.normal(ks[2], (C, 3 * C, 3, 3), jnp.float32) * 0.1,  # fuse
        'bf':   jax.random.normal(ks[3], (C,), jnp.float32) * 0.1,
        'wsup': jax.random.normal(ks[4], (1, C, 1, 1), jnp.float32) * 0.2,      # sup
        'bsup': jax.random.normal(ks[5], (1,), jnp.float32) * 0.1,
    }

    out, sup, third = info_block_forward(params, x0, x1, fdm)
    jax.block_until_ready((out, sup))
    assert third is None

    ref_out, ref_sup = ref_forward(params, x0, x1)
    # DEFAULT-precision MXU matmuls round operands to bf16 (f32 accumulation); at these
    # magnitudes the element-wise error is bounded well below 1e-2, hence 2e-2 tolerances.
    np.testing.assert_allclose(np.asarray(out), np.asarray(ref_out), rtol=2e-2, atol=2e-2)
    np.testing.assert_allclose(np.asarray(sup), np.asarray(ref_sup), rtol=2e-2, atol=2e-2)

    print("KERNEL_OK")
</pallas_src>

<mosaic_0001>
module attributes {stable_mosaic.version = 11 : i64} {
  func.func @kernel(%arg0: i32, %arg1: memref<8x128xf32, #tpu.memory_space<vmem>>, %arg2: memref<8x512xf32, #tpu.memory_space<vmem>>, %arg3: memref<128x512xf32, #tpu.memory_space<vmem>>, %arg4: memref<9x1x512xf32, #tpu.memory_space<vmem>>, %arg5: memref<72x8xf32, #tpu.memory_space<vmem>>, %arg6: memref<1x8xf32, #tpu.memory_space<vmem>>, %arg7: memref<72x24xf32, #tpu.memory_space<vmem>>, %arg8: memref<4x512xf32, #tpu.memory_space<vmem>>, %arg9: memref<1x512xf32, #tpu.memory_space<vmem>>) attributes {dimension_semantics = [#tpu.dimension_semantics<arbitrary>], iteration_bounds = array<i64: 1>, scalar_prefetch = 0 : i64, scratch_operands = 0 : i64, tpu.core_type = #tpu.core_type<tc>, window_params = [{pipeline_mode = #tpu.pipeline_mode<synchronous>, transform_indices = @transform_0, window_bounds = array<i64: 8, 128>}, {pipeline_mode = #tpu.pipeline_mode<synchronous>, transform_indices = @transform_1, window_bounds = array<i64: 8, 512>}, {pipeline_mode = #tpu.pipeline_mode<synchronous>, transform_indices = @transform_2, window_bounds = array<i64: 128, 512>}, {pipeline_mode = #tpu.pipeline_mode<synchronous>, transform_indices = @transform_3, window_bounds = array<i64: 9, 1, 512>}, {pipeline_mode = #tpu.pipeline_mode<synchronous>, transform_indices = @transform_4, window_bounds = array<i64: 72, 8>}, {pipeline_mode = #tpu.pipeline_mode<synchronous>, transform_indices = @transform_5, window_bounds = array<i64: 1, 8>}, {pipeline_mode = #tpu.pipeline_mode<synchronous>, transform_indices = @transform_6, window_bounds = array<i64: 72, 24>}, {pipeline_mode = #tpu.pipeline_mode<synchronous>, transform_indices = @transform_7, window_bounds = array<i64: 4, 512>}, {pipeline_mode = #tpu.pipeline_mode<synchronous>, transform_indices = @transform_8, window_bounds = array<i64: 1, 512>}]} {
    %c0 = arith.constant 0 : index
    %c0_0 = arith.constant 0 : index
    %0 = vector.load %arg1[%c0, %c0_0] : memref<8x128xf32, #tpu.memory_space<vmem>>, vector<8x128xf32>
    %c0_1 = arith.constant 0 : index
    %c0_2 = arith.constant 0 : index
    %1 = vector.load %arg2[%c0_1, %c0_2] : memref<8x512xf32, #tpu.memory_space<vmem>>, vector<8x512xf32>
    %c0_3 = arith.constant 0 : index
    %c0_4 = arith.constant 0 : index
    %2 = vector.load %arg3[%c0_3, %c0_4] : memref<128x512xf32, #tpu.memory_space<vmem>>, vector<128x512xf32>
    %cst = arith.constant dense<0.000000e+00> : vector<8x512xf32>
    %3 = tpu.matmul %0, %2, %cst {dimension_numbers = #tpu.dot_dimension_numbers<[1], [0], [0], [1], [0, 0, 1, 1], [], []>} : vector<8x128xf32>, vector<128x512xf32>, vector<8x512xf32> -> vector<8x512xf32>
    %c0_5 = arith.constant 0 : index
    %c0_6 = arith.constant 0 : index
    %4 = vector.load %arg5[%c0_5, %c0_6] : memref<72x8xf32, #tpu.memory_space<vmem>>, vector<72x8xf32>
    %5 = arith.subf %3, %1 : vector<8x512xf32>
    %cst_7 = arith.constant dense<0.000000e+00> : vector<72x512xf32>
    %6 = tpu.matmul %4, %5, %cst_7 {dimension_numbers = #tpu.dot_dimension_numbers<[1], [0], [0], [1], [0, 0, 1, 1], [], []>} : vector<72x8xf32>, vector<8x512xf32>, vector<72x512xf32> -> vector<72x512xf32>
    %cst_8 = arith.constant 0.000000e+00 : f32
    %7 = vector.broadcast %cst_8 : f32 to vector<8x512xf32>
    %8 = vector.extract_strided_slice %6 {offsets = [0, 0], sizes = [8, 512], strides = [1, 1]} : vector<72x512xf32> to vector<8x512xf32>
    %c17_i32 = arith.constant 17 : i32
    %9 = tpu.dynamic_rotate %8 by %c17_i32 dim 1 : vector<8x512xf32>, i32 -> vector<8x512xf32>
    %c0_9 = arith.constant 0 : index
    %c0_10 = arith.constant 0 : index
    %c0_11 = arith.constant 0 : index
    %10 = vector.load %arg4[%c0_9, %c0_10, %c0_11] : memref<9x1x512xf32, #tpu.memory_space<vmem>>, vector<1x1x512xf32>
    %11 = vector.shape_cast %10 : vector<1x1x512xf32> to vector<1x512xf32>
    %12 = vector.broadcast %11 : vector<1x512xf32> to vector<8x512xf32>
    %13 = arith.mulf %9, %12 : vector<8x512xf32>
    %14 = arith.addf %7, %13 : vector<8x512xf32>
    %15 = vector.extract_strided_slice %6 {offsets = [8, 0], sizes = [8, 512], strides = [1, 1]} : vector<72x512xf32> to vector<8x512xf32>
    %c16_i32 = arith.constant 16 : i32
    %16 = tpu.dynamic_rotate %15 by %c16_i32 dim 1 : vector<8x512xf32>, i32 -> vector<8x512xf32>
    %c1 = arith.constant 1 : index
    %c0_12 = arith.constant 0 : index
    %c0_13 = arith.constant 0 : index
    %17 = vector.load %arg4[%c1, %c0_12, %c0_13] : memref<9x1x512xf32, #tpu.memory_space<vmem>>, vector<1x1x512xf32>
    %18 = vector.shape_cast %17 : vector<1x1x512xf32> to vector<1x512xf32>
    %19 = vector.broadcast %18 : vector<1x512xf32> to vector<8x512xf32>
    %20 = arith.mulf %16, %19 : vector<8x512xf32>
    %21 = arith.addf %14, %20 : vector<8x512xf32>
    %22 = vector.extract_strided_slice %6 {offsets = [16, 0], sizes = [8, 512], strides = [1, 1]} : vector<72x512xf32> to vector<8x512xf32>
    %c15_i32 = arith.constant 15 : i32
    %23 = tpu.dynamic_rotate %22 by %c15_i32 dim 1 : vector<8x512xf32>, i32 -> vector<8x512xf32>
    %c2 = arith.constant 2 : index
    %c0_14 = arith.constant 0 : index
    %c0_15 = arith.constant 0 : index
    %24 = vector.load %arg4[%c2, %c0_14, %c0_15] : memref<9x1x512xf32, #tpu.memory_space<vmem>>, vector<1x1x512xf32>
    %25 = vector.shape_cast %24 : vector<1x1x512xf32> to vector<1x512xf32>
    %26 = vector.broadcast %25 : vector<1x512xf32> to vector<8x512xf32>
    %27 = arith.mulf %23, %26 : vector<8x512xf32>
    %28 = arith.addf %21, %27 : vector<8x512xf32>
    %29 = vector.extract_strided_slice %6 {offsets = [24, 0], sizes = [8, 512], strides = [1, 1]} : vector<72x512xf32> to vector<8x512xf32>
    %c1_i32 = arith.constant 1 : i32
    %30 = tpu.dynamic_rotate %29 by %c1_i32 dim 1 : vector<8x512xf32>, i32 -> vector<8x512xf32>
    %c3 = arith.constant 3 : index
    %c0_16 = arith.constant 0 : index
    %c0_17 = arith.constant 0 : index
    %31 = vector.load %arg4[%c3, %c0_16, %c0_17] : memref<9x1x512xf32, #tpu.memory_space<vmem>>, vector<1x1x512xf32>
    %32 = vector.shape_cast %31 : vector<1x1x512xf32> to vector<1x512xf32>
    %33 = vector.broadcast %32 : vector<1x512xf32> to vector<8x512xf32>
    %34 = arith.mulf %30, %33 : vector<8x512xf32>
    %35 = arith.addf %28, %34 : vector<8x512xf32>
    %36 = vector.extract_strided_slice %6 {offsets = [32, 0], sizes = [8, 512], strides = [1, 1]} : vector<72x512xf32> to vector<8x512xf32>
    %37 = arith.addf %35, %36 : vector<8x512xf32>
    %38 = vector.extract_strided_slice %6 {offsets = [40, 0], sizes = [8, 512], strides = [1, 1]} : vector<72x512xf32> to vector<8x512xf32>
    %c511_i32 = arith.constant 511 : i32
    %39 = tpu.dynamic_rotate %38 by %c511_i32 dim 1 : vector<8x512xf32>, i32 -> vector<8x512xf32>
    %c5 = arith.constant 5 : index
    %c0_18 = arith.constant 0 : index
    %c0_19 = arith.constant 0 : index
    %40 = vector.load %arg4[%c5, %c0_18, %c0_19] : memref<9x1x512xf32, #tpu.memory_space<vmem>>, vector<1x1x512xf32>
    %41 = vector.shape_cast %40 : vector<1x1x512xf32> to vector<1x512xf32>
    %42 = vector.broadcast %41 : vector<1x512xf32> to vector<8x512xf32>
    %43 = arith.mulf %39, %42 : vector<8x512xf32>
    %44 = arith.addf %37, %43 : vector<8x512xf32>
    %45 = vector.extract_strided_slice %6 {offsets = [48, 0], sizes = [8, 512], strides = [1, 1]} : vector<72x512xf32> to vector<8x512xf32>
    %c497_i32 = arith.constant 497 : i32
    %46 = tpu.dynamic_rotate %45 by %c497_i32 dim 1 : vector<8x512xf32>, i32 -> vector<8x512xf32>
    %c6 = arith.constant 6 : index
    %c0_20 = arith.constant 0 : index
    %c0_21 = arith.constant 0 : index
    %47 = vector.load %arg4[%c6, %c0_20, %c0_21] : memref<9x1x512xf32, #tpu.memory_space<vmem>>, vector<1x1x512xf32>
    %48 = vector.shape_cast %47 : vector<1x1x512xf32> to vector<1x512xf32>
    %49 = vector.broadcast %48 : vector<1x512xf32> to vector<8x512xf32>
    %50 = arith.mulf %46, %49 : vector<8x512xf32>
    %51 = arith.addf %44, %50 : vector<8x512xf32>
    %52 = vector.extract_strided_slice %6 {offsets = [56, 0], sizes = [8, 512], strides = [1, 1]} : vector<72x512xf32> to vector<8x512xf32>
    %c496_i32 = arith.constant 496 : i32
    %53 = tpu.dynamic_rotate %52 by %c496_i32 dim 1 : vector<8x512xf32>, i32 -> vector<8x512xf32>
    %c7 = arith.constant 7 : index
    %c0_22 = arith.constant 0 : index
    %c0_23 = arith.constant 0 : index
    %54 = vector.load %arg4[%c7, %c0_22, %c0_23] : memref<9x1x512xf32, #tpu.memory_space<vmem>>, vector<1x1x512xf32>
    %55 = vector.shape_cast %54 : vector<1x1x512xf32> to vector<1x512xf32>
    %56 = vector.broadcast %55 : vector<1x512xf32> to vector<8x512xf32>
    %57 = arith.mulf %53, %56 : vector<8x512xf32>
    %58 = arith.addf %51, %57 : vector<8x512xf32>
    %59 = vector.extract_strided_slice %6 {offsets = [64, 0], sizes = [8, 512], strides = [1, 1]} : vector<72x512xf32> to vector<8x512xf32>
    %c495_i32 = arith.constant 495 : i32
    %60 = tpu.dynamic_rotate %59 by %c495_i32 dim 1 : vector<8x512xf32>, i32 -> vector<8x512xf32>
    %c8 = arith.constant 8 : index
    %c0_24 = arith.constant 0 : index
    %c0_25 = arith.constant 0 : index
    %61 = vector.load %arg4[%c8, %c0_24, %c0_25] : memref<9x1x512xf32, #tpu.memory_space<vmem>>, vector<1x1x512xf32>
    %62 = vector.shape_cast %61 : vector<1x1x512xf32> to vector<1x512xf32>
    %63 = vector.broadcast %62 : vector<1x512xf32> to vector<8x512xf32>
    %64 = arith.mulf %60, %63 : vector<8x512xf32>
    %65 = arith.addf %58, %64 : vector<8x512xf32>
    %cst_26 = arith.constant 0.000000e+00 : f32
    %66 = vector.broadcast %cst_26 : f32 to vector<8x512xf32>
    %67 = arith.subf %66, %65 : vector<8x512xf32>
    %68 = math.exp %67 : vector<8x512xf32>
    %cst_27 = arith.constant 1.000000e+00 : f32
    %69 = vector.broadcast %cst_27 : f32 to vector<8x512xf32>
    %70 = arith.addf %69, %68 : vector<8x512xf32>
    %71 = tpu.reciprocal %70 {approx = true} : vector<8x512xf32> -> vector<8x512xf32>
    %c0_28 = arith.constant 0 : index
    %c0_29 = arith.constant 0 : index
    %72 = vector.load %arg6[%c0_28, %c0_29] : memref<1x8xf32, #tpu.memory_space<vmem>>, vector<1x8xf32>
    %cst_30 = arith.constant dense<0.000000e+00> : vector<1x512xf32>
    %73 = tpu.matmul %72, %3, %cst_30 {dimension_numbers = #tpu.dot_dimension_numbers<[1], [0], [0], [1], [0, 0, 1, 1], [], []>} : vector<1x8xf32>, vector<8x512xf32>, vector<1x512xf32> -> vector<1x512xf32>
    %c0_31 = arith.constant 0 : index
    %c0_32 = arith.constant 0 : index
    %74 = vector.load %arg9[%c0_31, %c0_32] : memref<1x512xf32, #tpu.memory_space<vmem>>, vector<1x512xf32>
    tpu.vector_store %arg9[%c0_31, %c0_32], %73 {strides = array<i32>} : memref<1x512xf32, #tpu.memory_space<vmem>>, vector<1x512xf32>,
    %cst_33 = arith.constant 0.000000e+00 : f32
    %75 = vector.broadcast %cst_33 : f32 to vector<1x512xf32>
    %76 = arith.subf %75, %73 : vector<1x512xf32>
    %77 = math.exp %76 : vector<1x512xf32>
    %cst_34 = arith.constant 1.000000e+00 : f32
    %78 = vector.broadcast %cst_34 : f32 to vector<1x512xf32>
    %79 = arith.addf %78, %77 : vector<1x512xf32>
    %80 = tpu.reciprocal %79 {approx = true} : vector<1x512xf32> -> vector<1x512xf32>
    %81 = arith.mulf %3, %71 : vector<8x512xf32>
    %82 = vector.broadcast %80 : vector<1x512xf32> to vector<8x512xf32>
    %83 = arith.mulf %1, %82 : vector<8x512xf32>
    %84 = tpu.concatenate %81, %1, %83 in 0 : vector<8x512xf32>, vector<8x512xf32>, vector<8x512xf32> -> vector<24x512xf32>
    %c0_35 = arith.constant 0 : index
    %c0_36 = arith.constant 0 : index
    %85 = vector.load %arg7[%c0_35, %c0_36] : memref<72x24xf32, #tpu.memory_space<vmem>>, vector<72x24xf32>
    %cst_37 = arith.constant dense<0.000000e+00> : vector<72x512xf32>
    %86 = tpu.matmul %85, %84, %cst_37 {dimension_numbers = #tpu.dot_dimension_numbers<[1], [0], [0], [1], [0, 0, 1, 1], [], []>} : vector<72x24xf32>, vector<24x512xf32>, vector<72x512xf32> -> vector<72x512xf32>
    %cst_38 = arith.constant 0.000000e+00 : f32
    %87 = vector.broadcast %cst_38 : f32 to vector<8x512xf32>
    %88 = vector.extract_strided_slice %86 {offsets = [0, 0], sizes = [8, 512], strides = [1, 1]} : vector<72x512xf32> to vector<8x512xf32>
    %c17_i32_39 = arith.constant 17 : i32
    %89 = tpu.dynamic_rotate %88 by %c17_i32_39 dim 1 : vector<8x512xf32>, i32 -> vector<8x512xf32>
    %c0_40 = arith.constant 0 : index
    %c0_41 = arith.constant 0 : index
    %c0_42 = arith.constant 0 : index
    %90 = vector.load %arg4[%c0_40, %c0_41, %c0_42] : memref<9x1x512xf32, #tpu.memory_space<vmem>>, vector<1x1x512xf32>
    %91 = vector.shape_cast %90 : vector<1x1x512xf32> to vector<1x512xf32>
    %92 = vector.broadcast %91 : vector<1x512xf32> to vector<8x512xf32>
    %93 = arith.mulf %89, %92 : vector<8x512xf32>
    %94 = arith.addf %87, %93 : vector<8x512xf32>
    %95 = vector.extract_strided_slice %86 {offsets = [8, 0], sizes = [8, 512], strides = [1, 1]} : vector<72x512xf32> to vector<8x512xf32>
    %c16_i32_43 = arith.constant 16 : i32
    %96 = tpu.dynamic_rotate %95 by %c16_i32_43 dim 1 : vector<8x512xf32>, i32 -> vector<8x512xf32>
    %c1_44 = arith.constant 1 : index
    %c0_45 = arith.constant 0 : index
    %c0_46 = arith.constant 0 : index
    %97 = vector.load %arg4[%c1_44, %c0_45, %c0_46] : memref<9x1x512xf32, #tpu.memory_space<vmem>>, vector<1x1x512xf32>
    %98 = vector.shape_cast %97 : vector<1x1x512xf32> to vector<1x512xf32>
    %99 = vector.broadcast %98 : vector<1x512xf32> to vector<8x512xf32>
    %100 = arith.mulf %96, %99 : vector<8x512xf32>
    %101 = arith.addf %94, %100 : vector<8x512xf32>
    %102 = vector.extract_strided_slice %86 {offsets = [16, 0], sizes = [8, 512], strides = [1, 1]} : vector<72x512xf32> to vector<8x512xf32>
    %c15_i32_47 = arith.constant 15 : i32
    %103 = tpu.dynamic_rotate %102 by %c15_i32_47 dim 1 : vector<8x512xf32>, i32 -> vector<8x512xf32>
    %c2_48 = arith.constant 2 : index
    %c0_49 = arith.constant 0 : index
    %c0_50 = arith.constant 0 : index
    %104 = vector.load %arg4[%c2_48, %c0_49, %c0_50] : memref<9x1x512xf32, #tpu.memory_space<vmem>>, vector<1x1x512xf32>
    %105 = vector.shape_cast %104 : vector<1x1x512xf32> to vector<1x512xf32>
    %106 = vector.broadcast %105 : vector<1x512xf32> to vector<8x512xf32>
    %107 = arith.mulf %103, %106 : vector<8x512xf32>
    %108 = arith.addf %101, %107 : vector<8x512xf32>
    %109 = vector.extract_strided_slice %86 {offsets = [24, 0], sizes = [8, 512], strides = [1, 1]} : vector<72x512xf32> to vector<8x512xf32>
    %c1_i32_51 = arith.constant 1 : i32
    %110 = tpu.dynamic_rotate %109 by %c1_i32_51 dim 1 : vector<8x512xf32>, i32 -> vector<8x512xf32>
    %c3_52 = arith.constant 3 : index
    %c0_53 = arith.constant 0 : index
    %c0_54 = arith.constant 0 : index
    %111 = vector.load %arg4[%c3_52, %c0_53, %c0_54] : memref<9x1x512xf32, #tpu.memory_space<vmem>>, vector<1x1x512xf32>
    %112 = vector.shape_cast %111 : vector<1x1x512xf32> to vector<1x512xf32>
    %113 = vector.broadcast %112 : vector<1x512xf32> to vector<8x512xf32>
    %114 = arith.mulf %110, %113 : vector<8x512xf32>
    %115 = arith.addf %108, %114 : vector<8x512xf32>
    %116 = vector.extract_strided_slice %86 {offsets = [32, 0], sizes = [8, 512], strides = [1, 1]} : vector<72x512xf32> to vector<8x512xf32>
    %117 = arith.addf %115, %116 : vector<8x512xf32>
    %118 = vector.extract_strided_slice %86 {offsets = [40, 0], sizes = [8, 512], strides = [1, 1]} : vector<72x512xf32> to vector<8x512xf32>
    %c511_i32_55 = arith.constant 511 : i32
    %119 = tpu.dynamic_rotate %118 by %c511_i32_55 dim 1 : vector<8x512xf32>, i32 -> vector<8x512xf32>
    %c5_56 = arith.constant 5 : index
    %c0_57 = arith.constant 0 : index
    %c0_58 = arith.constant 0 : index
    %120 = vector.load %arg4[%c5_56, %c0_57, %c0_58] : memref<9x1x512xf32, #tpu.memory_space<vmem>>, vector<1x1x512xf32>
    %121 = vector.shape_cast %120 : vector<1x1x512xf32> to vector<1x512xf32>
    %122 = vector.broadcast %121 : vector<1x512xf32> to vector<8x512xf32>
    %123 = arith.mulf %119, %122 : vector<8x512xf32>
    %124 = arith.addf %117, %123 : vector<8x512xf32>
    %125 = vector.extract_strided_slice %86 {offsets = [48, 0], sizes = [8, 512], strides = [1, 1]} : vector<72x512xf32> to vector<8x512xf32>
    %c497_i32_59 = arith.constant 497 : i32
    %126 = tpu.dynamic_rotate %125 by %c497_i32_59 dim 1 : vector<8x512xf32>, i32 -> vector<8x512xf32>
    %c6_60 = arith.constant 6 : index
    %c0_61 = arith.constant 0 : index
    %c0_62 = arith.constant 0 : index
    %127 = vector.load %arg4[%c6_60, %c0_61, %c0_62] : memref<9x1x512xf32, #tpu.memory_space<vmem>>, vector<1x1x512xf32>
    %128 = vector.shape_cast %127 : vector<1x1x512xf32> to vector<1x512xf32>
    %129 = vector.broadcast %128 : vector<1x512xf32> to vector<8x512xf32>
    %130 = arith.mulf %126, %129 : vector<8x512xf32>
    %131 = arith.addf %124, %130 : vector<8x512xf32>
    %132 = vector.extract_strided_slice %86 {offsets = [56, 0], sizes = [8, 512], strides = [1, 1]} : vector<72x512xf32> to vector<8x512xf32>
    %c496_i32_63 = arith.constant 496 : i32
    %133 = tpu.dynamic_rotate %132 by %c496_i32_63 dim 1 : vector<8x512xf32>, i32 -> vector<8x512xf32>
    %c7_64 = arith.constant 7 : index
    %c0_65 = arith.constant 0 : index
    %c0_66 = arith.constant 0 : index
    %134 = vector.load %arg4[%c7_64, %c0_65, %c0_66] : memref<9x1x512xf32, #tpu.memory_space<vmem>>, vector<1x1x512xf32>
    %135 = vector.shape_cast %134 : vector<1x1x512xf32> to vector<1x512xf32>
    %136 = vector.broadcast %135 : vector<1x512xf32> to vector<8x512xf32>
    %137 = arith.mulf %133, %136 : vector<8x512xf32>
    %138 = arith.addf %131, %137 : vector<8x512xf32>
    %139 = vector.extract_strided_slice %86 {offsets = [64, 0], sizes = [8, 512], strides = [1, 1]} : vector<72x512xf32> to vector<8x512xf32>
    %c495_i32_67 = arith.constant 495 : i32
    %140 = tpu.dynamic_rotate %139 by %c495_i32_67 dim 1 : vector<8x512xf32>, i32 -> vector<8x512xf32>
    %c8_68 = arith.constant 8 : index
    %c0_69 = arith.constant 0 : index
    %c0_70 = arith.constant 0 : index
    %141 = vector.load %arg4[%c8_68, %c0_69, %c0_70] : memref<9x1x512xf32, #tpu.memory_space<vmem>>, vector<1x1x512xf32>
    %142 = vector.shape_cast %141 : vector<1x1x512xf32> to vector<1x512xf32>
    %143 = vector.broadcast %142 : vector<1x512xf32> to vector<8x512xf32>
    %144 = arith.mulf %140, %143 : vector<8x512xf32>
    %145 = arith.addf %138, %144 : vector<8x512xf32>
    %146 = vector.extract_strided_slice %145 {offsets = [0, 0], sizes = [4, 512], strides = [1, 1]} : vector<8x512xf32> to vector<4x512xf32>
    %c0_71 = arith.constant 0 : index
    %c0_72 = arith.constant 0 : index
    %147 = vector.load %arg8[%c0_71, %c0_72] : memref<4x512xf32, #tpu.memory_space<vmem>>, vector<4x512xf32>
    tpu.vector_store %arg8[%c0_71, %c0_72], %146 {strides = array<i32>} : memref<4x512xf32, #tpu.memory_space<vmem>>, vector<4x512xf32>,
    return
  }
  func.func @transform_0(%arg0: i32) -> (i32, i32) {
    %c0_i32 = arith.constant 0 : i32
    %c0_i32_0 = arith.constant 0 : i32
    %c0_i32_1 = arith.constant 0 : i32
    return %c0_i32, %c0_i32_0 : i32, i32
  }
  func.func @transform_1(%arg0: i32) -> (i32, i32) {
    %c0_i32 = arith.constant 0 : i32
    %c0_i32_0 = arith.constant 0 : i32
    %c0_i32_1 = arith.constant 0 : i32
    return %c0_i32, %c0_i32_0 : i32, i32
  }
  func.func @transform_2(%arg0: i32) -> (i32, i32) {
    %c0_i32 = arith.constant 0 : i32
    %c0_i32_0 = arith.constant 0 : i32
    %c0_i32_1 = arith.constant 0 : i32
    return %c0_i32, %c0_i32_0 : i32, i32
  }
  func.func @transform_3(%arg0: i32) -> (i32, i32, i32) {
    %c0_i32 = arith.constant 0 : i32
    %c0_i32_0 = arith.constant 0 : i32
    %c0_i32_1 = arith.constant 0 : i32
    %c0_i32_2 = arith.constant 0 : i32
    return %c0_i32, %c0_i32_0, %c0_i32_1 : i32, i32, i32
  }
  func.func @transform_4(%arg0: i32) -> (i32, i32) {
    %c0_i32 = arith.constant 0 : i32
    %c0_i32_0 = arith.constant 0 : i32
    %c0_i32_1 = arith.constant 0 : i32
    return %c0_i32, %c0_i32_0 : i32, i32
  }
  func.func @transform_5(%arg0: i32) -> (i32, i32) {
    %c0_i32 = arith.constant 0 : i32
    %c0_i32_0 = arith.constant 0 : i32
    %c0_i32_1 = arith.constant 0 : i32
    return %c0_i32, %c0_i32_0 : i32, i32
  }
  func.func @transform_6(%arg0: i32) -> (i32, i32) {
    %c0_i32 = arith.constant 0 : i32
    %c0_i32_0 = arith.constant 0 : i32
    %c0_i32_1 = arith.constant 0 : i32
    return %c0_i32, %c0_i32_0 : i32, i32
  }
  func.func @transform_7(%arg0: i32) -> (i32, i32) {
    %c0_i32 = arith.constant 0 : i32
    %c0_i32_0 = arith.constant 0 : i32
    %c0_i32_1 = arith.constant 0 : i32
    return %c0_i32, %c0_i32_0 : i32, i32
  }
  func.func @transform_8(%arg0: i32) -> (i32, i32) {
    %c0_i32 = arith.constant 0 : i32
    %c0_i32_0 = arith.constant 0 : i32
    %c0_i32_1 = arith.constant 0 : i32
    return %c0_i32, %c0_i32_0 : i32, i32
  }
}

</mosaic_0001>

<bundles_post_ra>
// kernel: tpu_custom_call.1
= control target key start
LH: loop header
LB: loop body
LE: loop exit
PB: predicated region body
PF: predicated region fallthrough
CT: control target
= control target key end

     0   :  { %14 = vsyncpa [#allocation3], 0  ;;  %s2787_s0 = inlined_call_operand.vmem [shape: f32[8,128], index: 0, kind: input, shape index: {}]   ;;  %s2788_s1 = inlined_call_operand.vmem [shape: f32[8,512], index: 1, kind: input, shape index: {}]   ;;  %s2789_s2 = inlined_call_operand.hbm [shape: f32[128,512], index: 2, kind: input, shape index: {}]   ;;  %s2790_s3 = inlined_call_operand.vmem [shape: f32[9,1,512], index: 3, kind: input, shape index: {}]   ;;  %s2791_s4 = inlined_call_operand.vmem [shape: f32[72,8], index: 4, kind: input, shape index: {}]   ;;  %s2792_s5 = inlined_call_operand.vmem [shape: f32[1,8], index: 5, kind: input, shape index: {}]   ;;  %s2793_s6 = inlined_call_operand.vmem [shape: f32[72,24], index: 6, kind: input, shape index: {}]   ;;  %s2794_s7 = inlined_call_operand.hbm [shape: f32[4,512], index: 7, kind: output, shape index: {0}]   ;;  %s2795_s8 = inlined_call_operand.hbm [shape: f32[1,512], index: 8, kind: output, shape index: {1}]  }
   0x1   :  { %15 = vsyncpa [#allocation4], 0 }
   0x2   :  { %16 = vsyncpa [#allocation7], 0  ;;  %s1954_s27 = smov [#allocation2]  }
   0x3   :  { %s26_s28 = sshll.u32 %s1954_s27, 4  ;;  %s27_s28 = int_to_ptr.vmem [resolvable:$true] %s26_s28 }
   0x4   :  { %s1896_s29 = scalar_lea.vmem %s27_s28, 8192  ;;  %p1901_p1 = scmp.lt.s32.totalorder %s27_s28, %s27_s28 }
   0x5   :  { %p1897_p0 = scmp.ne.s32.totalorder %s27_s28, %s1896_s29  ;;  %p1902_p2 = scmp.lt.s32.totalorder %s1896_s29, %s1896_s29 }
   0x7   :  { %p1903_p3 = por %p1902_p2, %p1901_p1 }
   0x9   :  { %p1904_p4 = pnand %p1903_p3, %p1897_p0 }
   0xb   :  { %1907 = shalt.err (!%p1904_p4)
}
   0xc   :  { %s1955_s30 = smov 512   ;;  %s1956_s9 = smov 32  }
   0xd   :  { %32 = dma.hbm_to_vmem [thread:$0]  %s2789_s2, 8192, %s27_s28, [#allocation3], %s1955_s30, %s1955_s30, %s1956_s9  }
   0xe   :  { %1948 = dma.done.wait [#allocation3], 8192  }
   0xf   :  { %1949 = vsyncadd [#allocation3], 4294959104  ;;  %v2796_v0 = vmov 0.0   ;;  %v110_v1 = vld [vmem:[#allocation2 + $0x1e8] sm:$0xff]  ;;  %v112_v2 = vld [vmem:[#allocation2 + $0x1f8] sm:$0xff]  ;;  %vm268_vm0 = vcmask 64512  }
  0x10   :  { %177 = vmatprep.mubr.f32.mxu0 %v2796_v0  ;;  %248 = vmatprep.mubr.f32.mxu1 %v2796_v0  ;;  %v109_v3 = vld [vmem:[#allocation2 + $0x1e0] sm:$0xff]  ;;  %v111_v4 = vld [vmem:[#allocation2 + $0x1f0] sm:$0xff]  ;;  %v106_v5 = vld [vmem:[#allocation2 + $0x1c8] sm:$0xff]  ;;  %s1960_s15 = smov 15   ;;  %s1961_s16 = smov 1   ;;  %vm1144_vm10 = vcmask 195584  }
  0x11   :  { %113 = vmatprep.subr.mxu0 %v110_v1  ;;  %184 = vmatprep.subr.mxu1 %v112_v2  ;;  %v108_v6 = vld [vmem:[#allocation2 + $0x1d8] sm:$0xff]  ;;  %v105_v7 = vld [vmem:[#allocation2 + $0x1c0] sm:$0xff]  ;;  %v107_v8 = vld [vmem:[#allocation2 + $0x1d0] sm:$0xff]  ;;  %s1962_s17 = smov 127   ;;  %s1963_s18 = smov 113  }
  0x12   :  { %114 = vmatpush1.msra.mxu0 %v109_v3  ;;  %185 = vmatpush1.msra.mxu1 %v111_v4  ;;  %v102_v9 = vld [vmem:[#allocation2 + $0x1a8] sm:$0xff]  ;;  %v104_v10 = vld [vmem:[#allocation2 + $0x1b8] sm:$0xff]  ;;  %v101_v11 = vld [vmem:[#allocation2 + $0x1a0] sm:$0xff]  ;;  %s1965_s19 = smov 112   ;;  %s1966_s20 = smov 111  }
  0x13   :  { %115 = vmatprep.subr.mxu0 %v106_v5  ;;  %186 = vmatprep.subr.mxu1 %v108_v6  ;;  %v103_v12 = vld [vmem:[#allocation2 + $0x1b0] sm:$0xff]  ;;  %v98_v13 = vld [vmem:[#allocation2 + $0x188] sm:$0xff]  ;;  %v100_v14 = vld [vmem:[#allocation2 + $0x198] sm:$0xff] }
  0x14   :  { %116 = vmatpush1.msra.mxu0 %v105_v7  ;;  %187 = vmatpush1.msra.mxu1 %v107_v8  ;;  %v97_v15 = vld [vmem:[#allocation2 + $0x180] sm:$0xff]  ;;  %v99_v16 = vld [vmem:[#allocation2 + $0x190] sm:$0xff]  ;;  %v94_v17 = vld [vmem:[#allocation2 + $0x168] sm:$0xff] }
  0x15   :  { %117 = vmatprep.subr.mxu0 %v102_v9  ;;  %188 = vmatprep.subr.mxu1 %v104_v10  ;;  %v96_v18 = vld [vmem:[#allocation2 + $0x178] sm:$0xff]  ;;  %v93_v19 = vld [vmem:[#allocation2 + $0x160] sm:$0xff]  ;;  %v95_v20 = vld [vmem:[#allocation2 + $0x170] sm:$0xff] }
  0x16   :  { %118 = vmatpush1.msra.mxu0 %v101_v11  ;;  %189 = vmatpush1.msra.mxu1 %v103_v12  ;;  %v90_v21 = vld [vmem:[#allocation2 + $0x148] sm:$0xff]  ;;  %v92_v22 = vld [vmem:[#allocation2 + $0x158] sm:$0xff]  ;;  %v89_v23 = vld [vmem:[#allocation2 + $0x140] sm:$0xff] }
  0x17   :  { %119 = vmatprep.subr.mxu0 %v98_v13  ;;  %190 = vmatprep.subr.mxu1 %v100_v14  ;;  %v91_v24 = vld [vmem:[#allocation2 + $0x150] sm:$0xff]  ;;  %v86_v25 = vld [vmem:[#allocation2 + $0x128] sm:$0xff]  ;;  %v88_v26 = vld [vmem:[#allocation2 + $0x138] sm:$0xff] }
  0x18   :  { %120 = vmatpush1.msra.mxu0 %v97_v15  ;;  %191 = vmatpush1.msra.mxu1 %v99_v16  ;;  %v85_v27 = vld [vmem:[#allocation2 + $0x120] sm:$0xff]  ;;  %v87_v28 = vld [vmem:[#allocation2 + $0x130] sm:$0xff]  ;;  %v82_v29 = vld [vmem:[#allocation2 + $0x108] sm:$0xff] }
  0x19   :  { %121 = vmatprep.subr.mxu0 %v94_v17  ;;  %192 = vmatprep.subr.mxu1 %v96_v18  ;;  %v84_v30 = vld [vmem:[#allocation2 + $0x118] sm:$0xff]  ;;  %v81_v31 = vld [vmem:[#allocation2 + $0x100] sm:$0xff]  ;;  %v83_v32 = vld [vmem:[#allocation2 + $0x110] sm:$0xff] }
  0x1a   :  { %122 = vmatpush1.msra.mxu0 %v93_v19  ;;  %193 = vmatpush1.msra.mxu1 %v95_v20  ;;  %v78_v33 = vld [vmem:[#allocation2 + $0xe8] sm:$0xff]  ;;  %v80_v34 = vld [vmem:[#allocation2 + $0xf8] sm:$0xff]  ;;  %v77_v35 = vld [vmem:[#allocation2 + $0xe0] sm:$0xff] }
  0x1b   :  { %123 = vmatprep.subr.mxu0 %v90_v21  ;;  %194 = vmatprep.subr.mxu1 %v92_v22  ;;  %v79_v36 = vld [vmem:[#allocation2 + $0xf0] sm:$0xff]  ;;  %v74_v37 = vld [vmem:[#allocation2 + $0xc8] sm:$0xff]  ;;  %v76_v38 = vld [vmem:[#allocation2 + $0xd8] sm:$0xff] }
  0x1c   :  { %124 = vmatpush1.msra.mxu0 %v89_v23  ;;  %195 = vmatpush1.msra.mxu1 %v91_v24  ;;  %v73_v39 = vld [vmem:[#allocation2 + $0xc0] sm:$0xff]  ;;  %v75_v40 = vld [vmem:[#allocation2 + $0xd0] sm:$0xff]  ;;  %v70_v41 = vld [vmem:[#allocation2 + $0xa8] sm:$0xff] }
  0x1d   :  { %125 = vmatprep.subr.mxu0 %v86_v25  ;;  %196 = vmatprep.subr.mxu1 %v88_v26  ;;  %v72_v42 = vld [vmem:[#allocation2 + $0xb8] sm:$0xff]  ;;  %v69_v43 = vld [vmem:[#allocation2 + $0xa0] sm:$0xff]  ;;  %v71_v44 = vld [vmem:[#allocation2 + $0xb0] sm:$0xff] }
  0x1e   :  { %126 = vmatpush1.msra.mxu0 %v85_v27  ;;  %197 = vmatpush1.msra.mxu1 %v87_v28  ;;  %v66_v45 = vld [vmem:[#allocation2 + $0x88] sm:$0xff]  ;;  %v68_v46 = vld [vmem:[#allocation2 + $0x98] sm:$0xff]  ;;  %v65_v47 = vld [vmem:[#allocation2 + $0x80] sm:$0xff] }
  0x1f   :  { %127 = vmatprep.subr.mxu0 %v82_v29  ;;  %198 = vmatprep.subr.mxu1 %v84_v30  ;;  %v67_v48 = vld [vmem:[#allocation2 + $0x90] sm:$0xff]  ;;  %v62_v49 = vld [vmem:[#allocation2 + $0x68] sm:$0xff]  ;;  %v64_v50 = vld [vmem:[#allocation2 + $0x78] sm:$0xff] }
  0x20   :  { %128 = vmatpush1.msra.mxu0 %v81_v31  ;;  %199 = vmatpush1.msra.mxu1 %v83_v32  ;;  %v61_v51 = vld [vmem:[#allocation2 + $0x60] sm:$0xff]  ;;  %v63_v52 = vld [vmem:[#allocation2 + $0x70] sm:$0xff]  ;;  %v58_v53 = vld [vmem:[#allocation2 + $0x48] sm:$0xff] }
  0x21   :  { %129 = vmatprep.subr.mxu0 %v78_v33  ;;  %200 = vmatprep.subr.mxu1 %v80_v34  ;;  %v60_v54 = vld [vmem:[#allocation2 + $0x58] sm:$0xff]  ;;  %v57_v55 = vld [vmem:[#allocation2 + $0x40] sm:$0xff]  ;;  %v59_v56 = vld [vmem:[#allocation2 + $0x50] sm:$0xff] }
  0x22   :  { %130 = vmatpush1.msra.mxu0 %v77_v35  ;;  %201 = vmatpush1.msra.mxu1 %v79_v36  ;;  %v54_v57 = vld [vmem:[#allocation2 + $0x28] sm:$0xff]  ;;  %v56_v58 = vld [vmem:[#allocation2 + $0x38] sm:$0xff]  ;;  %v53_v59 = vld [vmem:[#allocation2 + $0x20] sm:$0xff] }
  0x23   :  { %131 = vmatprep.subr.mxu0 %v74_v37  ;;  %202 = vmatprep.subr.mxu1 %v76_v38  ;;  %v55_v60 = vld [vmem:[#allocation2 + $0x30] sm:$0xff]  ;;  %v50_v61 = vld [vmem:[#allocation2 + $0x8] sm:$0xff]  ;;  %v52_v62 = vld [vmem:[#allocation2 + $0x18] sm:$0xff] }
  0x24   :  { %132 = vmatpush1.msra.mxu0 %v73_v39  ;;  %203 = vmatpush1.msra.mxu1 %v75_v40  ;;  %v49_v63 = vld [vmem:[#allocation2] sm:$0xff]  ;;  %v51_v1 = vld [vmem:[#allocation2 + $0x10] sm:$0xff]  ;;  %v2036_v6 = vld [vmem:[%s2788_s1 + $0x8] sm:$0xff] }
  0x25   :  { %133 = vmatprep.subr.mxu0 %v70_v41  ;;  %204 = vmatprep.subr.mxu1 %v72_v42  ;;  %v44_v2 = vld [vmem:[%s2787_s0] sm:$0xff]  ;;  %v2027_v3 = vld [vmem:[%s2788_s1 + $0x10] sm:$0xff]  ;;  %v2041_v7 = vld [vmem:[%s2788_s1 + $0x18] sm:$0xff] }
  0x26   :  { %134 = vmatpush1.msra.mxu0 %v69_v43  ;;  %205 = vmatpush1.msra.mxu1 %v71_v44  ;;  %v2046_v8 = vld [vmem:[%s2788_s1] sm:$0xff]  ;;  %v256_v16 = vld [vmem:[%s2791_s4 + $0x8] sm:$0xff]  ;;  %v257_v17 = vld [vmem:[%s2791_s4 + $0x10] sm:$0xff] }
  0x27   :  { %135 = vmatprep.subr.mxu0 %v66_v45  ;;  %206 = vmatprep.subr.mxu1 %v68_v46  ;;  %v255_v15 = vld [vmem:[%s2791_s4] sm:$0xff]  ;;  %v258_v18 = vld [vmem:[%s2791_s4 + $0x18] sm:$0xff]  ;;  %v260_v20 = vld [vmem:[%s2791_s4 + $0x28] sm:$0xff] }
  0x28   :  { %136 = vmatpush1.msra.mxu0 %v65_v47  ;;  %207 = vmatpush1.msra.mxu1 %v67_v48  ;;  %v259_v19 = vld [vmem:[%s2791_s4 + $0x20] sm:$0xff]  ;;  %v261_v21 = vld [vmem:[%s2791_s4 + $0x30] sm:$0xff]  ;;  %v262_v22 = vld [vmem:[%s2791_s4 + $0x38] sm:$0xff] }
  0x29   :  { %137 = vmatprep.subr.mxu0 %v62_v49  ;;  %208 = vmatprep.subr.mxu1 %v64_v50  ;;  %v263_v23 = vld [vmem:[%s2791_s4 + $0x40] sm:$0xff]  ;;  %s1958_s4 = smov 17  }
  0x2a   :  { %138 = vmatpush1.msra.mxu0 %v61_v51  ;;  %209 = vmatpush1.msra.mxu1 %v63_v52  ;;  %v911_v24 = vld [vmem:[%s2792_s5] sm:$0x1]  ;;  %s1959_s5 = smov 16  }
  0x2b   :  { %139 = vmatprep.subr.mxu0 %v58_v53  ;;  %210 = vmatprep.subr.mxu1 %v60_v54 }
  0x2c   :  { %140 = vmatpush1.msra.mxu0 %v57_v55  ;;  %211 = vmatpush1.msra.mxu1 %v59_v56 }
  0x2d   :  { %141 = vmatprep.subr.mxu0 %v54_v57  ;;  %212 = vmatprep.subr.mxu1 %v56_v58 }
  0x2e   :  { %142 = vmatpush1.msra.mxu0 %v53_v59  ;;  %213 = vmatpush1.msra.mxu1 %v55_v60  ;;  %v542_v60 = vlaneseq }
  0x2f   :  { %143 = vmatprep.subr.mxu0 %v50_v61  ;;  %214 = vmatprep.subr.mxu1 %v52_v62 }
  0x30   :  { %144 = vmatpush1.msra.mxu0 %v49_v63  ;;  %215 = vmatpush1.msra.mxu1 %v51_v1  ;;  %v1964_v63 = vmov 1966171168   ;;  %vm1088_vm1 = vcmp.lt.s32.totalorder %v542_v60, 512 }
  0x31   :  { %178 = vmatmul.mubr.f32.vlgmr.msra.gmra.mxu0 %v44_v2  ;;  %249 = vmatmul.mubr.f32.vlgmr.msra.gmra.mxu1 %v44_v2  ;;  %v1064_v1 = vunpack.c.l.s4 %v1964_v63 }
  0x32   :  { %360 = vmatprep.mubr.f32.mxu0 %v2796_v0  ;;  %479 = vmatprep.mubr.f32.mxu1 %v2796_v0 }
  0xf1   :  { %v2029_v4 = vpop.f32.mrf.mxu0  ;;  %v2031_v5 = vpop.f32.mrf.mxu1 }
  0xf2   :  { %v266_v9 = vsub.f32 %v2031_v5, %v2027_v3  ;;  %v264_v14 = vsub.f32 %v2029_v4, %v2046_v8 }
  0xf3   :  { %v2050_v10 = vpop.f32.mrf.mxu0  ;;  %v2052_v11 = vpop.f32.mrf.mxu1 }
  0xf4   :  { %v265_v12 = vsub.f32 %v2050_v10, %v2036_v6  ;;  %v267_v13 = vsub.f32 %v2052_v11, %v2041_v7 }
  0xf6   :  { %326 = vmatprep.subr.mxu0 %v265_v12  ;;  %445 = vmatprep.subr.mxu1 %v267_v13  ;;  %v1065_v13 = vunpack.c.0.s8 %v1064_v1 }
  0xf7   :  { %327 = vmatpush1.msra.mxu0 %v264_v14  ;;  %446 = vmatpush1.msra.mxu1 %v266_v9  ;;  %v2165_v9 = vshrl.u32 %v542_v60, 7 }
  0xf8   :  { %1789 = vmatmul.mubr.msk.f32.vlgmr.msra.gmra.mxu0 %vm268_vm0, %v255_v15  ;;  %1798 = vmatmul.mubr.msk.f32.vlgmr.msra.gmra.mxu1 %vm268_vm0, %v255_v15 }
  0xf9   :  { %945 = vmatprep.subr.mxu0 %v2050_v10  ;;  %1016 = vmatprep.subr.mxu1 %v2052_v11 }
  0xfa   :  { %946 = vmatpush1.msra.mxu0 %v2029_v4  ;;  %1017 = vmatpush1.msra.mxu1 %v2031_v5 }
  0xfb   :  { %366 = vmatprep.mubr.f32.mxu0 %v2796_v0  ;;  %485 = vmatprep.mubr.f32.mxu1 %v2796_v0 }
  0xfc   :  { %1790 = vmatmul.mubr.msk.f32.gmra.mxu0 %vm268_vm0, %v256_v16  ;;  %1799 = vmatmul.mubr.msk.f32.gmra.mxu1 %vm268_vm0, %v256_v16 }
  0xfd   :  { %372 = vmatprep.mubr.f32.mxu0 %v2796_v0  ;;  %491 = vmatprep.mubr.f32.mxu1 %v2796_v0 }
 0x100   :  { %1791 = vmatmul.mubr.msk.f32.gmra.mxu0 %vm268_vm0, %v257_v17  ;;  %1800 = vmatmul.mubr.msk.f32.gmra.mxu1 %vm268_vm0, %v257_v17 }
 0x101   :  { %378 = vmatprep.mubr.f32.mxu0 %v2796_v0  ;;  %497 = vmatprep.mubr.f32.mxu1 %v2796_v0 }
 0x104   :  { %1792 = vmatmul.mubr.msk.f32.gmra.mxu0 %vm268_vm0, %v258_v18  ;;  %1801 = vmatmul.mubr.msk.f32.gmra.mxu1 %vm268_vm0, %v258_v18  ;;  %v1068_v18 = vsub.s32 %v1065_v13, %v2165_v9  ;;  %v2214_v13 = vsub.s32 3, %v2165_v9 }
 0x105   :  { %384 = vmatprep.mubr.f32.mxu0 %v2796_v0  ;;  %503 = vmatprep.mubr.f32.mxu1 %v2796_v0 }
 0x108   :  { %1793 = vmatmul.mubr.msk.f32.gmra.mxu0 %vm268_vm0, %v259_v19  ;;  %1802 = vmatmul.mubr.msk.f32.gmra.mxu1 %vm268_vm0, %v259_v19 }
 0x109   :  { %390 = vmatprep.mubr.f32.mxu0 %v2796_v0  ;;  %509 = vmatprep.mubr.f32.mxu1 %v2796_v0 }
 0x10c   :  { %1794 = vmatmul.mubr.msk.f32.gmra.mxu0 %vm268_vm0, %v260_v20  ;;  %1803 = vmatmul.mubr.msk.f32.gmra.mxu1 %vm268_vm0, %v260_v20 }
 0x10d   :  { %396 = vmatprep.mubr.f32.mxu0 %v2796_v0  ;;  %515 = vmatprep.mubr.f32.mxu1 %v2796_v0 }
 0x110   :  { %1795 = vmatmul.mubr.msk.f32.gmra.mxu0 %vm268_vm0, %v261_v21  ;;  %1804 = vmatmul.mubr.msk.f32.gmra.mxu1 %vm268_vm0, %v261_v21 }
 0x111   :  { %402 = vmatprep.mubr.f32.mxu0 %v2796_v0  ;;  %521 = vmatprep.mubr.f32.mxu1 %v2796_v0 }
 0x114   :  { %1796 = vmatmul.mubr.msk.f32.gmra.mxu0 %vm268_vm0, %v262_v22  ;;  %1805 = vmatmul.mubr.msk.f32.gmra.mxu1 %vm268_vm0, %v262_v22 }
 0x115   :  { %408 = vmatprep.mubr.f32.mxu0 %v2796_v0  ;;  %527 = vmatprep.mubr.f32.mxu1 %v2796_v0 }
 0x118   :  { %1797 = vmatmul.mubr.msk.f32.gmra.mxu0 %vm268_vm0, %v263_v23  ;;  %1806 = vmatmul.mubr.msk.f32.gmra.mxu1 %vm268_vm0, %v263_v23 }
 0x119   :  { %979 = vmatprep.mubr.f32.mxu0 %v2796_v0  ;;  %1050 = vmatprep.mubr.f32.mxu1 %v2796_v0 }
 0x11c   :  { %1814 = vmatmul.mubr.msk.f32.vlgmr.msra.gmra.mxu0 %vm268_vm0, %v911_v24  ;;  %1815 = vmatmul.mubr.msk.f32.vlgmr.msra.gmra.mxu1 %vm268_vm0, %v911_v24 }
 0x11d   :  { %1236 = vmatprep.mubr.f32.mxu0 %v2796_v0  ;;  %1355 = vmatprep.mubr.f32.mxu1 %v2796_v0 }
 0x1b8   :  { %v362_v25 = vpop.f32.mrf.mxu0  ;;  %v481_v26 = vpop.f32.mrf.mxu1 }
 0x1b9   :  { %538 = vrot.lane.b32.xlu1 %v481_v26, %s1958_s4  ;;  %534 = vrot.lane.b32.xlu0 %v362_v25, %s1958_s4 }
 0x1ba   :  { %v364_v27 = vpop.f32.mrf.mxu0  ;;  %v483_v28 = vpop.f32.mrf.mxu1 }
 0x1bc   :  { %v368_v29 = vpop.f32.mrf.mxu0  ;;  %v487_v30 = vpop.f32.mrf.mxu1 }
 0x1bd   :  { %540 = vrot.lane.b32.xlu1 %v483_v28, %s1958_s4  ;;  %536 = vrot.lane.b32.xlu0 %v364_v27, %s1958_s4 }
 0x1be   :  { %v370_v31 = vpop.f32.mrf.mxu0  ;;  %v489_v32 = vpop.f32.mrf.mxu1 }
 0x1c0   :  { %v374_v33 = vpop.f32.mrf.mxu0  ;;  %v493_v34 = vpop.f32.mrf.mxu1 }
 0x1c1   :  { %579 = vrot.lane.b32.xlu0 %v368_v29, %s1959_s5  ;;  %581 = vrot.lane.b32.xlu1 %v370_v31, %s1959_s5 }
 0x1c2   :  { %v376_v35 = vpop.f32.mrf.mxu0  ;;  %v495_v36 = vpop.f32.mrf.mxu1 }
 0x1c4   :  { %v380_v37 = vpop.f32.mrf.mxu0  ;;  %v499_v38 = vpop.f32.mrf.mxu1 }
 0x1c5   :  { %583 = vrot.lane.b32.xlu0 %v487_v30, %s1959_s5  ;;  %585 = vrot.lane.b32.xlu1 %v489_v32, %s1959_s5 }
 0x1c6   :  { %v382_v39 = vpop.f32.mrf.mxu0  ;;  %v501_v40 = vpop.f32.mrf.mxu1 }
 0x1c8   :  { %v2142_v41 = vpop.f32.mrf.mxu0  ;;  %v2144_v42 = vpop.f32.mrf.mxu1 }
 0x1c9   :  { %623 = vrot.lane.b32.xlu0 %v374_v33, %s1960_s15  ;;  %625 = vrot.lane.b32.xlu1 %v376_v35, %s1960_s15 }
 0x1ca   :  { %v2148_v43 = vpop.f32.mrf.mxu0  ;;  %v2150_v44 = vpop.f32.mrf.mxu1 }
 0x1cc   :  { %v392_v45 = vpop.f32.mrf.mxu0  ;;  %v511_v46 = vpop.f32.mrf.mxu1 }
 0x1cd   :  { %627 = vrot.lane.b32.xlu0 %v493_v34, %s1960_s15  ;;  %629 = vrot.lane.b32.xlu1 %v495_v36, %s1960_s15 }
 0x1ce   :  { %v394_v47 = vpop.f32.mrf.mxu0  ;;  %v513_v48 = vpop.f32.mrf.mxu1 }
 0x1d0   :  { %v398_v49 = vpop.f32.mrf.mxu0  ;;  %v517_v50 = vpop.f32.mrf.mxu1 }
 0x1d1   :  { %667 = vrot.lane.b32.xlu0 %v380_v37, %s1961_s16  ;;  %669 = vrot.lane.b32.xlu1 %v382_v39, %s1961_s16 }
 0x1d2   :  { %v400_v51 = vpop.f32.mrf.mxu0  ;;  %v519_v52 = vpop.f32.mrf.mxu1 }
 0x1d4   :  { %v404_v53 = vpop.f32.mrf.mxu0  ;;  %v523_v54 = vpop.f32.mrf.mxu1 }
 0x1d5   :  { %671 = vrot.lane.b32.xlu0 %v499_v38, %s1961_s16  ;;  %673 = vrot.lane.b32.xlu1 %v501_v40, %s1961_s16  ;;  %v2180_v38 = vsub.s32 0, %v2165_v9 }
 0x1d6   :  { %v406_v55 = vpop.f32.mrf.mxu0  ;;  %v525_v56 = vpop.f32.mrf.mxu1 }
 0x1d8   :  { %v410_v57 = vpop.f32.mrf.mxu0  ;;  %v529_v58 = vpop.f32.mrf.mxu1 }
 0x1d9   :  { %715 = vrot.lane.b32.xlu0 %v392_v45, %s1962_s17  ;;  %717 = vrot.lane.b32.xlu1 %v394_v47, %s1962_s17 }
 0x1da   :  { %v412_v59 = vpop.f32.mrf.mxu0  ;;  %v531_v61 = vpop.f32.mrf.mxu1 }
 0x1dc   :  { %v981_v62 = vpop.f32.mrf.mxu0  ;;  %v1052_v2 = vpop.f32.mrf.mxu1 }
 0x1dd   :  { %719 = vrot.lane.b32.xlu0 %v511_v46, %s1962_s17  ;;  %721 = vrot.lane.b32.xlu1 %v513_v48, %s1962_s17  ;;  %v1091_v16 = vsub.f32 0.0, %v981_v62  ;;  %v1093_v25 = vsub.f32 0.0, %v1052_v2 }
 0x1de   :  { %v983_v12 = vpop.f32.mrf.mxu0  ;;  %v1054_v15 = vpop.f32.mrf.mxu1 }
 0x1df   :  { %v1092_v14 = vsub.f32 0.0, %v983_v12  ;;  %v1061_v17 = vcombine.low %v981_v62, %v983_v12  ;;  %v1062_v19 = vcombine.low %v1052_v2, %v1054_v15  ;;  %v1095_v21 = vmul.f32 1.442695, %v1091_v16 }
 0x1e0   :  { %v1094_v24 = vsub.f32 0.0, %v1054_v15  ;;  %v1099_v28 = vmul.f32 1.442695, %v1093_v25  ;;  %v2211_v12 = vand.u32 127, %v542_v60  ;;  %v2222_v15 = vld [vmem:[%s2790_s3] sm:$0xf] }
 0x1e1   :  { %759 = vrot.lane.b32.xlu0 %v398_v49, %s1963_s18  ;;  %761 = vrot.lane.b32.xlu1 %v400_v51, %s1963_s18  ;;  %v1097_v20 = vmul.f32 1.442695, %v1092_v14  ;;  %v1069_v22 = vrot.slane %v1061_v17, %v1068_v18  ;;  %v1076_v23 = vrot.slane %v1062_v19, %v1068_v18  ;;  %v2217_v14 = vsub.s32 1, %v2165_v9  ;;  %v1807_v17 = vld [vmem:[%s2790_s3 + $0x4] sm:$0xf] }
 0x1e2   :  { %v1101_v27 = vmul.f32 1.442695, %v1094_v24  ;;  %v2225_v16 = vsub.s32 2, %v2165_v9  ;;  %v2233_v60 = vld [vmem:[%s2790_s3 + $0x8] sm:$0xf]  ;;  %vm544_vm2 = vcmp.lt.s32.totalorder %v2211_v12, 17  ;;  %v566_v9 = vrot.slane %v2222_v15, %v2214_v13 }
 0x1e3   :  { %1856 = vpow2.f32 %v1097_v20  ;;  %v1077_v26 = vcombine.low %v1069_v22, %v1076_v23  ;;  %v554_v20 = vrot.slane %v2222_v15, %v2180_v38  ;;  %vm587_vm3 = vcmp.lt.s32.totalorder %v2211_v12, 16  ;;  %v2254_v25 = vld [vmem:[%s2790_s3 + $0xc] sm:$0xf] }
 0x1e4   :  { %1858 = vpow2.f32 %v1095_v21  ;;  %v558_v21 = vrot.slane %v2222_v15, %v2217_v14  ;;  %v562_v22 = vrot.slane %v2222_v15, %v2225_v16  ;;  %v602_v23 = vrot.slane %v1807_v17, %v2217_v14 }
 0x1e5   :  { %763 = vrot.lane.b32.xlu0 %v517_v50, %s1963_s18  ;;  %765 = vrot.lane.b32.xlu1 %v519_v52, %s1963_s18  ;;  %1860 = vpow2.f32 %v1101_v27  ;;  %v1084_v29 = vrot.slane %v1077_v26, %v1068_v18  ;;  %v606_v24 = vrot.slane %v1807_v17, %v2225_v16  ;;  %v598_v26 = vrot.slane %v1807_v17, %v2180_v38 }
 0x1e6   :  { %1862 = vpow2.f32 %v1099_v28  ;;  %v610_v27 = vrot.slane %v1807_v17, %v2214_v13  ;;  %vm631_vm4 = vcmp.lt.s32.totalorder %v2211_v12, 15  ;;  %v646_v28 = vrot.slane %v2233_v60, %v2217_v14 }
 0x1e7   :  { %1090 = vst.msk [vmem:[#allocation6] sm:$0xf] %vm1088_vm1, %v1084_v29  ;;  %v2264_v29 = vld [vmem:[%s2790_s3 + $0x14] sm:$0xf]  ;;  %vm675_vm5 = vcmp.lt.s32.totalorder %v2211_v12, 1  ;;  %vm723_vm6 = vcmp.lt.s32.totalorder %v2211_v12, 127 }
 0x1e8   :  { %vm767_vm7 = vcmp.lt.s32.totalorder %v2211_v12, 113  ;;  %vm811_vm8 = vcmp.lt.s32.totalorder %v2211_v12, 112  ;;  %vm855_vm9 = vcmp.lt.s32.totalorder %v2211_v12, 111 }
 0x1e9   :  { %803 = vrot.lane.b32.xlu0 %v404_v53, %s1965_s19  ;;  %805 = vrot.lane.b32.xlu1 %v406_v55, %s1965_s19 }
 0x1ed   :  { %807 = vrot.lane.b32.xlu0 %v523_v54, %s1965_s19  ;;  %809 = vrot.lane.b32.xlu1 %v525_v56, %s1965_s19 }
 0x1f0   :  { %v1857_v30 = vpop.eup %1856 }
 0x1f1   :  { %847 = vrot.lane.b32.xlu0 %v410_v57, %s1966_s20  ;;  %849 = vrot.lane.b32.xlu1 %v412_v59, %s1966_s20  ;;  %v1859_v31 = vpop.eup %1858  ;;  %v1104_v32 = vadd.f32 1.0, %v1857_v30  ;;  %v650_v30 = vrot.slane %v2233_v60, %v2225_v16 }
 0x1f2   :  { %v1103_v33 = vadd.f32 1.0, %v1859_v31  ;;  %v1861_v34 = vpop.eup %1860  ;;  %v642_v31 = vrot.slane %v2233_v60, %v2180_v38 }
 0x1f3   :  { %1864 = vrcp.f32 %v1104_v32  ;;  %v1863_v35 = vpop.eup %1862  ;;  %v1106_v36 = vadd.f32 1.0, %v1861_v34  ;;  %v654_v32 = vrot.slane %v2233_v60, %v2214_v13 }
 0x1f4   :  { %1866 = vrcp.f32 %v1103_v33  ;;  %v1105_v37 = vadd.f32 1.0, %v1863_v35  ;;  %v2280_v35 = vld [vmem:[%s2790_s3 + $0x18] sm:$0xf] }
 0x1f5   :  { %851 = vrot.lane.b32.xlu0 %v529_v58, %s1966_s20  ;;  %853 = vrot.lane.b32.xlu1 %v531_v61, %s1966_s20  ;;  %1868 = vrcp.f32 %v1106_v36  ;;  %v690_v36 = vrot.slane %v2254_v25, %v2217_v14 }
 0x1f6   :  { %1870 = vrcp.f32 %v1105_v37  ;;  %v694_v37 = vrot.slane %v2254_v25, %v2225_v16 }
 0x200   :  { %v1865_v39 = vpop.eup %1864 }
 0x201   :  { %v1867_v40 = vpop.eup %1866  ;;  %v1122_v45 = vrot.slane %v1865_v39, %v2180_v38  ;;  %v686_v39 = vrot.slane %v2254_v25, %v2180_v38 }
 0x202   :  { %v1118_v46 = vrot.slane %v1867_v40, %v2180_v38  ;;  %v1869_v47 = vpop.eup %1868  ;;  %v698_v40 = vrot.slane %v2254_v25, %v2214_v13 }
 0x203   :  { %v1132_v48 = vmul.f32 %v1122_v45, %v2036_v6  ;;  %v1871_v49 = vpop.eup %1870  ;;  %v1130_v50 = vrot.slane %v1869_v47, %v2180_v38 }
 0x204   :  { %v1131_v51 = vmul.f32 %v1118_v46, %v2046_v8  ;;  %v1126_v52 = vrot.slane %v1871_v49, %v2180_v38  ;;  %v734_v46 = vrot.slane %v2264_v29, %v2180_v38 }
 0x205   :  { %1198 = vmatprep.subr.mxu0 %v1132_v48  ;;  %v1134_v53 = vmul.f32 %v1130_v50, %v2041_v7 }
 0x206   :  { %1199 = vmatpush1.msra.mxu0 %v1131_v51  ;;  %v1133_v54 = vmul.f32 %v1126_v52, %v2027_v3 }
 0x207   :  { %1200 = vmatprep.subr.mxu0 %v2036_v6  ;;  %1317 = vmatprep.subr.mxu1 %v1134_v53 }
 0x208   :  { %1201 = vmatpush1.msra.mxu0 %v2046_v8  ;;  %1318 = vmatpush1.msra.mxu1 %v1133_v54 }
 0x209   :  { %1319 = vmatprep.subr.mxu1 %v2041_v7 }
 0x20a   :  { %1320 = vmatpush1.msra.mxu1 %v2027_v3 }
 0x22b   :  { %v2194_v55 = vpop.permute.xlu1 %538  ;;  %v535_v56 = vpop.permute.xlu0 %534 }
 0x22f   :  { %v2196_v57 = vpop.permute.xlu1 %540  ;;  %v2198_v58 = vpop.permute.xlu0 %536 }
 0x230   :  { %v548_v53 = vsel %vm544_vm2, %v2196_v57, %v535_v56  ;;  %v547_v54 = vsel %vm544_vm2, %v535_v56, %v2198_v58  ;;  %v545_v51 = vsel %vm544_vm2, %v2194_v55, %v2196_v57  ;;  %v546_v25 = vsel %vm544_vm2, %v2198_v58, %v2194_v55 }
 0x231   :  { %v572_v58 = vmul.f32 %v558_v21, %v547_v54 }
 0x233   :  { %v580_v59 = vpop.permute.xlu0 %579  ;;  %v582_v61 = vpop.permute.xlu1 %581 }
 0x234   :  { %v590_v49 = vsel %vm587_vm3, %v580_v59, %v582_v61 }
 0x235   :  { %v616_v48 = vmul.f32 %v602_v23, %v590_v49 }
 0x237   :  { %v584_v62 = vpop.permute.xlu0 %583  ;;  %v586_v63 = vpop.permute.xlu1 %585 }
 0x238   :  { %v591_v45 = vsel %vm587_vm3, %v586_v63, %v580_v59  ;;  %v589_v0 = vsel %vm587_vm3, %v582_v61, %v584_v62  ;;  %v588_v52 = vsel %vm587_vm3, %v584_v62, %v586_v63  ;;  %v571_v62 = vmul.f32 %v554_v20, %v548_v53 }
 0x239   :  { %v615_v50 = vmul.f32 %v598_v26, %v591_v45  ;;  %v618_v23 = vmul.f32 %v610_v27, %v588_v52  ;;  %v573_v53 = vmul.f32 %v562_v22, %v546_v25  ;;  %v574_v27 = vmul.f32 %v566_v9, %v545_v51 }
 0x23b   :  { %v624_v6 = vpop.permute.xlu0 %623  ;;  %v2200_v1 = vpop.permute.xlu1 %625  ;;  %v619_v47 = vadd.f32 %v615_v50, %v571_v62  ;;  %v622_v50 = vadd.f32 %v618_v23, %v574_v27 }
 0x23c   :  { %v634_v56 = vsel %vm631_vm4, %v624_v6, %v2200_v1 }
 0x23d   :  { %v660_v26 = vmul.f32 %v646_v28, %v634_v56 }
 0x23f   :  { %v2202_v8 = vpop.permute.xlu0 %627  ;;  %v2204_v2 = vpop.permute.xlu1 %629 }
 0x240   :  { %v635_v59 = vsel %vm631_vm4, %v2204_v2, %v624_v6  ;;  %v633_v63 = vsel %vm631_vm4, %v2200_v1, %v2202_v8  ;;  %v617_v6 = vmul.f32 %v606_v24, %v589_v0  ;;  %v632_v20 = vsel %vm631_vm4, %v2202_v8, %v2204_v2  ;;  %v2361_v24 = vld [vmem:[%s2790_s3 + $0x1c] sm:$0xf] }
 0x241   :  { %v659_v57 = vmul.f32 %v642_v31, %v635_v59  ;;  %v661_v21 = vmul.f32 %v650_v30, %v633_v63  ;;  %v662_v30 = vmul.f32 %v654_v32, %v632_v20  ;;  %v822_v15 = vrot.slane %v2361_v24, %v2180_v38 }
 0x242   :  { %v621_v22 = vadd.f32 %v617_v6, %v573_v53  ;;  %v830_v51 = vrot.slane %v2361_v24, %v2225_v16  ;;  %v834_v54 = vrot.slane %v2361_v24, %v2214_v13 }
 0x243   :  { %v2206_v7 = vpop.permute.xlu0 %667  ;;  %v2208_v3 = vpop.permute.xlu1 %669  ;;  %v663_v8 = vadd.f32 %v659_v57, %v619_v47  ;;  %v666_v59 = vadd.f32 %v662_v30, %v622_v50 }
 0x244   :  { %v678_v55 = vsel %vm675_vm5, %v2206_v7, %v2208_v3 }
 0x245   :  { %v704_v0 = vmul.f32 %v690_v36, %v678_v55 }
 0x247   :  { %v2235_v18 = vpop.permute.xlu0 %671  ;;  %v2237_v19 = vpop.permute.xlu1 %673 }
 0x248   :  { %v679_v61 = vsel %vm675_vm5, %v2237_v19, %v2206_v7  ;;  %v677_v1 = vsel %vm675_vm5, %v2208_v3, %v2235_v18  ;;  %v620_v7 = vadd.f32 %v616_v48, %v572_v58  ;;  %v676_v2 = vsel %vm675_vm5, %v2235_v18, %v2237_v19  ;;  %v2378_v18 = vld [vmem:[%s2790_s3 + $0x20] sm:$0xf] }
 0x249   :  { %v703_v31 = vmul.f32 %v686_v39, %v679_v61  ;;  %v790_v3 = vrot.slane %v2280_v35, %v2214_v13  ;;  %v705_v36 = vmul.f32 %v694_v37, %v677_v1  ;;  %v665_v19 = vadd.f32 %v661_v21, %v621_v22 }
 0x24a   :  { %v664_v28 = vadd.f32 %v660_v26, %v620_v7  ;;  %v706_v47 = vmul.f32 %v698_v40, %v676_v2  ;;  %v826_v37 = vrot.slane %v2361_v24, %v2217_v14  ;;  %v866_v62 = vrot.slane %v2378_v18, %v2180_v38 }
 0x24b   :  { %v2273_v33 = vpop.permute.xlu0 %715  ;;  %v2275_v34 = vpop.permute.xlu1 %717  ;;  %v707_v52 = vadd.f32 %v703_v31, %v663_v8  ;;  %v709_v25 = vadd.f32 %v705_v36, %v665_v19  ;;  %v870_v23 = vrot.slane %v2378_v18, %v2217_v14  ;;  %v2800_v31 = vrot.slane %v2280_v35, %v2180_v38 }
 0x24c   :  { %v708_v9 = vadd.f32 %v704_v0, %v664_v28  ;;  %v726_v32 = vsel %vm723_vm6, %v2273_v33, %v2275_v34  ;;  %v2801_v24 = vrot.slane %v2264_v29, %v2214_v13  ;;  %v2802_v2 = vrot.slane %v2280_v35, %v2217_v14 }
 0x24d   :  { %v711_v63 = vadd.f32 %v707_v52, %v2142_v41  ;;  %v751_v57 = vmul.f32 %v734_v46, %v726_v32  ;;  %v2798_v46 = vrot.slane %v2264_v29, %v2217_v14  ;;  %v713_v1 = vadd.f32 %v709_v25, %v2144_v42 }
 0x24e   :  { %v712_v6 = vadd.f32 %v708_v9, %v2148_v43  ;;  %v874_v50 = vrot.slane %v2378_v18, %v2225_v16 }
 0x24f   :  { %v2316_v17 = vpop.permute.xlu0 %719  ;;  %v2318_v60 = vpop.permute.xlu1 %721  ;;  %v755_v0 = vadd.f32 %v751_v57, %v711_v63 }
 0x250   :  { %v725_v40 = vsel %vm723_vm6, %v2275_v34, %v2316_v17  ;;  %v724_v55 = vsel %vm723_vm6, %v2316_v17, %v2318_v60  ;;  %v710_v34 = vadd.f32 %v706_v47, %v666_v59  ;;  %v727_v41 = vsel %vm723_vm6, %v2318_v60, %v2273_v33 }
 0x251   :  { %v752_v26 = vmul.f32 %v2798_v46, %v725_v40  ;;  %v2799_v33 = vrot.slane %v2264_v29, %v2225_v16  ;;  %v754_v27 = vmul.f32 %v2801_v24, %v727_v41  ;;  %v878_v40 = vrot.slane %v2378_v18, %v2214_v13 }
 0x253   :  { %v760_v45 = vpop.permute.xlu0 %759  ;;  %v762_v49 = vpop.permute.xlu1 %761  ;;  %v753_v60 = vmul.f32 %v2799_v33, %v724_v55  ;;  %v756_v29 = vadd.f32 %v752_v26, %v712_v6 }
 0x254   :  { %v770_v58 = vsel %vm767_vm7, %v760_v45, %v762_v49 }
 0x255   :  { %v795_v53 = vmul.f32 %v2800_v31, %v770_v58  ;;  %v757_v52 = vadd.f32 %v753_v60, %v713_v1 }
 0x257   :  { %v764_v39 = vpop.permute.xlu0 %763  ;;  %v766_v48 = vpop.permute.xlu1 %765  ;;  %v799_v19 = vadd.f32 %v795_v53, %v755_v0 }
 0x258   :  { %v769_v17 = vsel %vm767_vm7, %v762_v49, %v764_v39  ;;  %v768_v20 = vsel %vm767_vm7, %v764_v39, %v766_v48  ;;  %v771_v7 = vsel %vm767_vm7, %v766_v48, %v760_v45  ;;  %v2803_v45 = vrot.slane %v2280_v35, %v2225_v16 }
 0x259   :  { %v796_v22 = vmul.f32 %v2802_v2, %v769_v17  ;;  %v714_v39 = vadd.f32 %v710_v34, %v2150_v44  ;;  %v798_v48 = vmul.f32 %v790_v3, %v771_v7 }
 0x25a   :  { %v797_v28 = vmul.f32 %v2803_v45, %v768_v20 }
 0x25b   :  { %v804_v56 = vpop.permute.xlu0 %803  ;;  %v806_v61 = vpop.permute.xlu1 %805  ;;  %v758_v25 = vadd.f32 %v754_v27, %v714_v39 }
 0x25c   :  { %v814_v43 = vsel %vm811_vm8, %v804_v56, %v806_v61  ;;  %v801_v44 = vadd.f32 %v797_v28, %v757_v52  ;;  %v2804_v52 = vmov 0.0  }
 0x25d   :  { %v839_v30 = vmul.f32 %v822_v15, %v814_v43  ;;  %v802_v63 = vadd.f32 %v798_v48, %v758_v25  ;;  %v1135_v48 = vld [vmem:[%s2793_s6] sm:$0xff] }
 0x25f   :  { %v808_v49 = vpop.permute.xlu0 %807  ;;  %v810_v21 = vpop.permute.xlu1 %809  ;;  %v843_v3 = vadd.f32 %v839_v30, %v799_v19  ;;  %v1140_v19 = vld [vmem:[%s2793_s6 + $0x28] sm:$0xff] }
 0x260   :  { %v813_v42 = vsel %vm811_vm8, %v806_v61, %v808_v49  ;;  %v812_v8 = vsel %vm811_vm8, %v808_v49, %v810_v21  ;;  %v815_v36 = vsel %vm811_vm8, %v810_v21, %v804_v56  ;;  %v800_v56 = vadd.f32 %v796_v22, %v756_v29 }
 0x261   :  { %v840_v9 = vmul.f32 %v826_v37, %v813_v42  ;;  %v841_v47 = vmul.f32 %v830_v51, %v812_v8  ;;  %v842_v35 = vmul.f32 %v834_v54, %v815_v36 }
 0x263   :  { %v848_v32 = vpop.permute.xlu0 %847  ;;  %v850_v59 = vpop.permute.xlu1 %849  ;;  %v844_v57 = vadd.f32 %v840_v9, %v800_v56  ;;  %v845_v55 = vadd.f32 %v841_v47, %v801_v44  ;;  %v846_v34 = vadd.f32 %v842_v35, %v802_v63  ;;  %v1141_v9 = vld [vmem:[%s2793_s6 + $0x30] sm:$0xff]  ;;  %v1142_v47 = vld [vmem:[%s2793_s6 + $0x38] sm:$0xff] }
 0x264   :  { %v858_v15 = vsel %vm855_vm9, %v848_v32, %v850_v59 }
 0x265   :  { %v883_v61 = vmul.f32 %v866_v62, %v858_v15 }
 0x267   :  { %v887_v58 = vadd.f32 %v883_v61, %v843_v3  ;;  %v852_v37 = vpop.permute.xlu0 %851  ;;  %v854_v51 = vpop.permute.xlu1 %853 }
 0x268   :  { %v857_v54 = vsel %vm855_vm9, %v850_v59, %v852_v37  ;;  %v856_v6 = vsel %vm855_vm9, %v852_v37, %v854_v51  ;;  %v859_v18 = vsel %vm855_vm9, %v854_v51, %v848_v32  ;;  %v1143_v32 = vld [vmem:[%s2793_s6 + $0x40] sm:$0xff] }
 0x269   :  { %v891_v41 = vsub.f32 0.0, %v887_v58  ;;  %v884_v46 = vmul.f32 %v870_v23, %v857_v54  ;;  %v885_v26 = vmul.f32 %v874_v50, %v856_v6  ;;  %v886_v62 = vmul.f32 %v878_v40, %v859_v18 }
 0x26b   :  { %v895_v17 = vmul.f32 1.442695, %v891_v41  ;;  %v888_v20 = vadd.f32 %v884_v46, %v844_v57  ;;  %v889_v43 = vadd.f32 %v885_v26, %v845_v55  ;;  %v890_v1 = vadd.f32 %v886_v62, %v846_v34 }
 0x26d   :  { %1872 = vpow2.f32 %v895_v17  ;;  %v892_v33 = vsub.f32 0.0, %v888_v20  ;;  %v893_v60 = vsub.f32 0.0, %v889_v43  ;;  %v894_v31 = vsub.f32 0.0, %v890_v1 }
 0x26f   :  { %v897_v53 = vmul.f32 1.442695, %v892_v33  ;;  %v899_v7 = vmul.f32 1.442695, %v893_v60  ;;  %v901_v49 = vmul.f32 1.442695, %v894_v31 }
 0x271   :  { %1874 = vpow2.f32 %v897_v53 }
 0x272   :  { %1876 = vpow2.f32 %v899_v7 }
 0x273   :  { %1878 = vpow2.f32 %v901_v49 }
 0x27a   :  { %v1873_v21 = vpop.eup %1872 }
 0x27b   :  { %v903_v0 = vadd.f32 1.0, %v1873_v21 }
 0x27d   :  { %1880 = vrcp.f32 %v903_v0 }
 0x27e   :  { %v1875_v24 = vpop.eup %1874 }
 0x27f   :  { %v1877_v23 = vpop.eup %1876  ;;  %v904_v27 = vadd.f32 1.0, %v1875_v24 }
 0x280   :  { %v1879_v42 = vpop.eup %1878  ;;  %v905_v8 = vadd.f32 1.0, %v1877_v23 }
 0x281   :  { %1882 = vrcp.f32 %v904_v27  ;;  %v906_v2 = vadd.f32 1.0, %v1879_v42 }
 0x282   :  { %1884 = vrcp.f32 %v905_v8 }
 0x283   :  { %1886 = vrcp.f32 %v906_v2 }
 0x28a   :  { %v1881_v22 = vpop.eup %1880 }
 0x28b   :  { %v1111_v29 = vmul.f32 %v1881_v22, %v2029_v4  ;;  %v1136_v4 = vld [vmem:[%s2793_s6 + $0x8] sm:$0xff] }
 0x28e   :  { %v1883_v45 = vpop.eup %1882 }
 0x28f   :  { %v1885_v28 = vpop.eup %1884  ;;  %v1112_v30 = vmul.f32 %v1883_v45, %v2050_v10  ;;  %v1138_v10 = vld [vmem:[%s2793_s6 + $0x18] sm:$0xff] }
 0x290   :  { %v1887_v36 = vpop.eup %1886  ;;  %v1113_v39 = vmul.f32 %v1885_v28, %v2031_v5  ;;  %v1137_v5 = vld [vmem:[%s2793_s6 + $0x10] sm:$0xff] }
 0x291   :  { %1202 = vmatprep.subr.mxu0 %v1112_v30  ;;  %v1114_v50 = vmul.f32 %v1887_v36, %v2052_v11  ;;  %v1139_v11 = vld [vmem:[%s2793_s6 + $0x20] sm:$0xff]  ;;  %s1967_s6 = smov [#allocation6]  }
 0x292   :  { %1203 = vmatpush1.msra.mxu0 %v1111_v29 }
 0x293   :  { %1321 = vmatprep.subr.mxu1 %v1114_v50  ;;  %1816 = vmatmul.mubr.msk.f32.vlgmr.msra.gmra.mxu0 %vm1144_vm10, %v1135_v48 }
 0x294   :  { %1322 = vmatpush1.msra.mxu1 %v1113_v39  ;;  %1242 = vmatprep.mubr.f32.mxu0 %v2804_v52 }
 0x295   :  { %1825 = vmatmul.mubr.msk.f32.vlgmr.msra.gmra.mxu1 %vm1144_vm10, %v1135_v48 }
 0x296   :  { %1361 = vmatprep.mubr.f32.mxu1 %v2804_v52 }
 0x297   :  { %1817 = vmatmul.mubr.msk.f32.gmra.mxu0 %vm1144_vm10, %v1136_v4 }
 0x298   :  { %1248 = vmatprep.mubr.f32.mxu0 %v2804_v52 }
 0x299   :  { %1826 = vmatmul.mubr.msk.f32.gmra.mxu1 %vm1144_vm10, %v1136_v4 }
 0x29a   :  { %1367 = vmatprep.mubr.f32.mxu1 %v2804_v52 }
 0x29b   :  { %1818 = vmatmul.mubr.msk.f32.gmra.mxu0 %vm1144_vm10, %v1137_v5 }
 0x29c   :  { %1254 = vmatprep.mubr.f32.mxu0 %v2804_v52 }
 0x29d   :  { %1827 = vmatmul.mubr.msk.f32.gmra.mxu1 %vm1144_vm10, %v1137_v5 }
 0x29e   :  { %1373 = vmatprep.mubr.f32.mxu1 %v2804_v52 }
 0x29f   :  { %1819 = vmatmul.mubr.msk.f32.gmra.mxu0 %vm1144_vm10, %v1138_v10 }
 0x2a0   :  { %1260 = vmatprep.mubr.f32.mxu0 %v2804_v52 }
 0x2a1   :  { %1828 = vmatmul.mubr.msk.f32.gmra.mxu1 %vm1144_vm10, %v1138_v10 }
 0x2a2   :  { %1379 = vmatprep.mubr.f32.mxu1 %v2804_v52 }
 0x2a3   :  { %1820 = vmatmul.mubr.msk.f32.gmra.mxu0 %vm1144_vm10, %v1139_v11 }
 0x2a4   :  { %1266 = vmatprep.mubr.f32.mxu0 %v2804_v52 }
 0x2a5   :  { %1829 = vmatmul.mubr.msk.f32.gmra.mxu1 %vm1144_vm10, %v1139_v11 }
 0x2a6   :  { %1385 = vmatprep.mubr.f32.mxu1 %v2804_v52 }
 0x2a7   :  { %1821 = vmatmul.mubr.msk.f32.gmra.mxu0 %vm1144_vm10, %v1140_v19 }
 0x2a8   :  { %1272 = vmatprep.mubr.f32.mxu0 %v2804_v52 }
 0x2a9   :  { %1830 = vmatmul.mubr.msk.f32.gmra.mxu1 %vm1144_vm10, %v1140_v19 }
 0x2aa   :  { %1391 = vmatprep.mubr.f32.mxu1 %v2804_v52 }
 0x2ab   :  { %1822 = vmatmul.mubr.msk.f32.gmra.mxu0 %vm1144_vm10, %v1141_v9 }
 0x2ac   :  { %1278 = vmatprep.mubr.f32.mxu0 %v2804_v52 }
 0x2ad   :  { %1831 = vmatmul.mubr.msk.f32.gmra.mxu1 %vm1144_vm10, %v1141_v9 }
 0x2ae   :  { %1397 = vmatprep.mubr.f32.mxu1 %v2804_v52 }
 0x2af   :  { %1823 = vmatmul.mubr.msk.f32.gmra.mxu0 %vm1144_vm10, %v1142_v47 }
 0x2b0   :  { %1284 = vmatprep.mubr.f32.mxu0 %v2804_v52 }
 0x2b1   :  { %1832 = vmatmul.mubr.msk.f32.gmra.mxu1 %vm1144_vm10, %v1142_v47 }
 0x2b2   :  { %1403 = vmatprep.mubr.f32.mxu1 %v2804_v52 }
 0x2b3   :  { %1824 = vmatmul.mubr.msk.f32.gmra.mxu0 %vm1144_vm10, %v1143_v32 }
 0x2b5   :  { %1833 = vmatmul.mubr.msk.f32.gmra.mxu1 %vm1144_vm10, %v1143_v32 }
 0x353   :  { %v1238_v59 = vpop.f32.mrf.mxu0 }
 0x354   :  { %1410 = vrot.lane.b32.xlu0 %v1238_v59, %s1958_s4 }
 0x355   :  { %v1240_v25 = vpop.f32.mrf.mxu0  ;;  %v1357_v35 = vpop.f32.mrf.mxu1 }
 0x356   :  { %1412 = vrot.lane.b32.xlu1 %v1240_v25, %s1958_s4 }
 0x357   :  { %v1359_v15 = vpop.f32.mrf.mxu1  ;;  %v1244_v40 = vpop.f32.mrf.mxu0 }
 0x358   :  { %1414 = vrot.lane.b32.xlu0 %v1357_v35, %s1958_s4 }
 0x359   :  { %v1246_v56 = vpop.f32.mrf.mxu0  ;;  %v1363_v44 = vpop.f32.mrf.mxu1 }
 0x35a   :  { %1416 = vrot.lane.b32.xlu1 %v1359_v15, %s1958_s4  ;;  %s1776_s4 = sshll.u32 %s1967_s6, 4  ;;  %s1777_s4 = int_to_ptr.vmem [resolvable:$true] %s1776_s4 }
 0x35b   :  { %v1250_v3 = vpop.f32.mrf.mxu0  ;;  %v1365_v61 = vpop.f32.mrf.mxu1  ;;  %p1913_p6 = scmp.lt.s32.totalorder %s1777_s4, %s1777_s4 }
 0x35c   :  { %1452 = vrot.lane.b32.xlu0 %v1244_v40, %s1959_s5 }
 0x35d   :  { %v1252_v63 = vpop.f32.mrf.mxu0  ;;  %v1369_v57 = vpop.f32.mrf.mxu1 }
 0x35e   :  { %1454 = vrot.lane.b32.xlu1 %v1246_v56, %s1959_s5 }
 0x35f   :  { %v1256_v55 = vpop.f32.mrf.mxu0  ;;  %v1371_v58 = vpop.f32.mrf.mxu1 }
 0x360   :  { %1456 = vrot.lane.b32.xlu0 %v1363_v44, %s1959_s5 }
 0x361   :  { %v1258_v37 = vpop.f32.mrf.mxu0  ;;  %v1375_v51 = vpop.f32.mrf.mxu1 }
 0x362   :  { %1458 = vrot.lane.b32.xlu1 %v1365_v61, %s1959_s5  ;;  %s1908_s5 = scalar_lea.vmem %s1777_s4, 64 }
 0x363   :  { %v2536_v34 = vpop.f32.mrf.mxu0  ;;  %v1377_v54 = vpop.f32.mrf.mxu1  ;;  %p1909_p5 = scmp.ne.s32.totalorder %s1777_s4, %s1908_s5  ;;  %p1914_p7 = scmp.lt.s32.totalorder %s1908_s5, %s1908_s5 }
 0x364   :  { %1494 = vrot.lane.b32.xlu0 %v1250_v3, %s1960_s15 }
 0x365   :  { %v2540_v6 = vpop.f32.mrf.mxu0  ;;  %v2542_v18 = vpop.f32.mrf.mxu1  ;;  %p1915_p8 = por %p1914_p7, %p1913_p6 }
 0x366   :  { %1496 = vrot.lane.b32.xlu1 %v1252_v63, %s1960_s15 }
 0x367   :  { %v1268_v41 = vpop.f32.mrf.mxu0  ;;  %v2546_v46 = vpop.f32.mrf.mxu1  ;;  %p1916_p9 = pnand %p1915_p8, %p1909_p5 }
 0x368   :  { %1498 = vrot.lane.b32.xlu0 %v1369_v57, %s1960_s15 }
 0x369   :  { %v1270_v26 = vpop.f32.mrf.mxu0  ;;  %v1387_v62 = vpop.f32.mrf.mxu1 }
 0x36a   :  { %1500 = vrot.lane.b32.xlu1 %v1371_v58, %s1960_s15 }
 0x36b   :  { %v1389_v17 = vpop.f32.mrf.mxu1  ;;  %v1274_v20 = vpop.f32.mrf.mxu0 }
 0x36c   :  { %1536 = vrot.lane.b32.xlu0 %v1256_v55, %s1961_s16 }
 0x36d   :  { %v1276_v43 = vpop.f32.mrf.mxu0  ;;  %v1393_v1 = vpop.f32.mrf.mxu1 }
 0x36e   :  { %1538 = vrot.lane.b32.xlu1 %v1258_v37, %s1961_s16 }
 0x36f   :  { %v1395_v33 = vpop.f32.mrf.mxu1  ;;  %v1280_v60 = vpop.f32.mrf.mxu0 }
 0x370   :  { %1540 = vrot.lane.b32.xlu0 %v1375_v51, %s1961_s16 }
 0x371   :  { %v1282_v31 = vpop.f32.mrf.mxu0  ;;  %v1399_v53 = vpop.f32.mrf.mxu1 }
 0x372   :  { %1542 = vrot.lane.b32.xlu1 %v1377_v54, %s1961_s16 }
 0x373   :  { %v1401_v7 = vpop.f32.mrf.mxu1  ;;  %v1286_v49 = vpop.f32.mrf.mxu0 }
 0x374   :  { %1582 = vrot.lane.b32.xlu0 %v1268_v41, %s1962_s17 }
 0x375   :  { %v1288_v21 = vpop.f32.mrf.mxu0  ;;  %v1405_v0 = vpop.f32.mrf.mxu1 }
 0x376   :  { %1584 = vrot.lane.b32.xlu1 %v1270_v26, %s1962_s17 }
 0x378   :  { %1586 = vrot.lane.b32.xlu0 %v1387_v62, %s1962_s17 }
 0x37a   :  { %1588 = vrot.lane.b32.xlu1 %v1389_v17, %s1962_s17 }
 0x37c   :  { %1624 = vrot.lane.b32.xlu0 %v1274_v20, %s1963_s18 }
 0x37e   :  { %1626 = vrot.lane.b32.xlu1 %v1276_v43, %s1963_s18 }
 0x380   :  { %1628 = vrot.lane.b32.xlu0 %v1393_v1, %s1963_s18 }
 0x382   :  { %1630 = vrot.lane.b32.xlu1 %v1395_v33, %s1963_s18 }
 0x384   :  { %1666 = vrot.lane.b32.xlu0 %v1280_v60, %s1965_s19 }
 0x386   :  { %1668 = vrot.lane.b32.xlu1 %v1282_v31, %s1965_s19 }
 0x388   :  { %1670 = vrot.lane.b32.xlu0 %v1399_v53, %s1965_s19 }
 0x38a   :  { %1672 = vrot.lane.b32.xlu1 %v1401_v7, %s1965_s19 }
 0x38c   :  { %1708 = vrot.lane.b32.xlu0 %v1286_v49, %s1966_s20 }
 0x38e   :  { %1710 = vrot.lane.b32.xlu1 %v1288_v21, %s1966_s20 }
 0x38f   :  { %1919 = shalt.err (!%p1916_p9)
}
 0x390   :  { %1779 = dma.vmem_to_hbm [thread:$0]  %s1777_s4, 64, %s2795_s8, [#allocation7]   ;;  %1712 = vrot.lane.b32.xlu0 %v1405_v0, %s1966_s20  ;;  %v1407_v24 = vpop.f32.mrf.mxu1  ;;  %v2575_v4 = vld [vmem:[%s2790_s3] sm:$0xf]  ;;  %v1834_v10 = vld [vmem:[%s2790_s3 + $0x4] sm:$0xf] }
 0x391   :  { %v2585_v11 = vld [vmem:[%s2790_s3 + $0x8] sm:$0xf]  ;;  %v1431_v9 = vrot.slane %v2575_v4, %v2217_v14  ;;  %v1435_v47 = vrot.slane %v2575_v4, %v2225_v16  ;;  %v1427_v32 = vrot.slane %v2575_v4, %v2180_v38  ;;  %v1439_v59 = vrot.slane %v2575_v4, %v2214_v13  ;;  %v2600_v25 = vld [vmem:[%s2790_s3 + $0xc] sm:$0xf]  ;;  %v2609_v44 = vld [vmem:[%s2790_s3 + $0x14] sm:$0xf] }
 0x392   :  { %1714 = vrot.lane.b32.xlu1 %v1407_v24, %s1966_s20  ;;  %v1473_v35 = vrot.slane %v1834_v10, %v2217_v14  ;;  %v1477_v15 = vrot.slane %v1834_v10, %v2225_v16  ;;  %v1469_v40 = vrot.slane %v1834_v10, %v2180_v38  ;;  %v1481_v56 = vrot.slane %v1834_v10, %v2214_v13  ;;  %v2634_v26 = vld [vmem:[%s2790_s3 + $0x18] sm:$0xf] }
 0x393   :  { %v1515_v61 = vrot.slane %v2585_v11, %v2217_v14  ;;  %v1519_v63 = vrot.slane %v2585_v11, %v2225_v16  ;;  %v1511_v57 = vrot.slane %v2585_v11, %v2180_v38  ;;  %v1523_v55 = vrot.slane %v2585_v11, %v2214_v13 }
 0x394   :  { %v1557_v37 = vrot.slane %v2600_v25, %v2217_v14  ;;  %v1561_v51 = vrot.slane %v2600_v25, %v2225_v16  ;;  %v1553_v54 = vrot.slane %v2600_v25, %v2180_v38  ;;  %v1565_v17 = vrot.slane %v2600_v25, %v2214_v13 }
 0x395   :  { %v1599_v20 = vrot.slane %v2609_v44, %v2180_v38  ;;  %v1603_v43 = vrot.slane %v2609_v44, %v2217_v14  ;;  %v1607_v60 = vrot.slane %v2609_v44, %v2225_v16  ;;  %v1611_v31 = vrot.slane %v2609_v44, %v2214_v13 }
 0x396   :  { %v1641_v21 = vrot.slane %v2634_v26, %v2180_v38 }
 0x3c6   :  { %v1411_v23 = vpop.permute.xlu0 %1410 }
 0x3c8   :  { %v1413_v27 = vpop.permute.xlu1 %1412 }
 0x3c9   :  { %v1420_v58 = vsel %vm544_vm2, %v1411_v23, %v1413_v27 }
 0x3ca   :  { %v1415_v42 = vpop.permute.xlu0 %1414  ;;  %v1445_v7 = vmul.f32 %v1431_v9, %v1420_v58 }
 0x3cb   :  { %v1419_v1 = vsel %vm544_vm2, %v1413_v27, %v1415_v42 }
 0x3cc   :  { %v1417_v8 = vpop.permute.xlu1 %1416  ;;  %v1446_v11 = vmul.f32 %v1435_v47, %v1419_v1 }
 0x3cd   :  { %v1421_v24 = vsel %vm544_vm2, %v1417_v8, %v1411_v23  ;;  %v1418_v23 = vsel %vm544_vm2, %v1415_v42, %v1417_v8 }
 0x3ce   :  { %v1453_v2 = vpop.permute.xlu0 %1452 }
 0x3d0   :  { %v1455_v22 = vpop.permute.xlu1 %1454 }
 0x3d1   :  { %v1462_v62 = vsel %vm587_vm3, %v1453_v2, %v1455_v22 }
 0x3d2   :  { %v1457_v45 = vpop.permute.xlu0 %1456  ;;  %v1487_v27 = vmul.f32 %v1473_v35, %v1462_v62  ;;  %v1444_v62 = vmul.f32 %v1427_v32, %v1421_v24 }
 0x3d4   :  { %v1459_v28 = vpop.permute.xlu1 %1458 }
 0x3d5   :  { %v1463_v33 = vsel %vm587_vm3, %v1459_v28, %v1453_v2  ;;  %v1461_v2 = vsel %vm587_vm3, %v1455_v22, %v1457_v45  ;;  %v1460_v9 = vsel %vm587_vm3, %v1457_v45, %v1459_v28 }
 0x3d6   :  { %v1495_v30 = vpop.permute.xlu0 %1494  ;;  %v1486_v25 = vmul.f32 %v1469_v40, %v1463_v33  ;;  %v1488_v1 = vmul.f32 %v1477_v15, %v1461_v2  ;;  %v1491_v40 = vadd.f32 %v1487_v27, %v1445_v7  ;;  %v1489_v33 = vmul.f32 %v1481_v56, %v1460_v9 }
 0x3d8   :  { %v1497_v36 = vpop.permute.xlu1 %1496 }
 0x3d9   :  { %v1504_v49 = vsel %vm631_vm4, %v1495_v30, %v1497_v36 }
 0x3da   :  { %v1499_v29 = vpop.permute.xlu0 %1498  ;;  %v1529_v35 = vmul.f32 %v1515_v61, %v1504_v49  ;;  %v1653_v49 = vrot.slane %v2634_v26, %v2214_v13 }
 0x3db   :  { %v1503_v22 = vsel %vm631_vm4, %v1497_v36, %v1499_v29  ;;  %v1490_v36 = vadd.f32 %v1486_v25, %v1444_v62 }
 0x3dc   :  { %v1501_v39 = vpop.permute.xlu1 %1500  ;;  %v1530_v61 = vmul.f32 %v1519_v63, %v1503_v22  ;;  %v1533_v15 = vadd.f32 %v1529_v35, %v1491_v40 }
 0x3dd   :  { %v1505_v4 = vsel %vm631_vm4, %v1501_v39, %v1495_v30  ;;  %v1502_v45 = vsel %vm631_vm4, %v1499_v29, %v1501_v39  ;;  %v2693_v29 = vld [vmem:[%s2790_s3 + $0x1c] sm:$0xf]  ;;  %v1447_v39 = vmul.f32 %v1439_v59, %v1418_v23 }
 0x3de   :  { %v1537_v48 = vpop.permute.xlu0 %1536  ;;  %v1528_v28 = vmul.f32 %v1511_v57, %v1505_v4  ;;  %v1531_v56 = vmul.f32 %v1523_v55, %v1502_v45  ;;  %v1683_v55 = vrot.slane %v2693_v29, %v2180_v38  ;;  %v1691_v4 = vrot.slane %v2693_v29, %v2225_v16 }
 0x3e0   :  { %v2568_v50 = vpop.permute.xlu1 %1538  ;;  %v1532_v63 = vadd.f32 %v1528_v28, %v1490_v36 }
 0x3e1   :  { %v1546_v58 = vsel %vm675_vm5, %v1537_v48, %v2568_v50 }
 0x3e2   :  { %v2570_v52 = vpop.permute.xlu0 %1540  ;;  %v1571_v0 = vmul.f32 %v1557_v37, %v1546_v58  ;;  %v1492_v37 = vadd.f32 %v1488_v1, %v1446_v11 }
 0x3e3   :  { %v1545_v42 = vsel %vm675_vm5, %v2568_v50, %v2570_v52  ;;  %v1649_v50 = vrot.slane %v2634_v26, %v2225_v16 }
 0x3e4   :  { %v2577_v5 = vpop.permute.xlu1 %1542  ;;  %v1572_v7 = vmul.f32 %v1561_v51, %v1545_v42  ;;  %v1534_v27 = vadd.f32 %v1530_v61, %v1492_v37  ;;  %v1687_v51 = vrot.slane %v2693_v29, %v2217_v14 }
 0x3e5   :  { %v1547_v30 = vsel %vm675_vm5, %v2577_v5, %v1537_v48  ;;  %v1544_v48 = vsel %vm675_vm5, %v2570_v52, %v2577_v5  ;;  %v2702_v52 = vld [vmem:[%s2790_s3 + $0x20] sm:$0xf]  ;;  %v1493_v5 = vadd.f32 %v1489_v33, %v1447_v39  ;;  %s1968_s3 = smov [#allocation5]  }
 0x3e6   :  { %v2587_v19 = vpop.permute.xlu0 %1582  ;;  %v1570_v32 = vmul.f32 %v1553_v54, %v1547_v30  ;;  %v1575_v54 = vadd.f32 %v1571_v0, %v1533_v15  ;;  %v1573_v59 = vmul.f32 %v1565_v17, %v1544_v48  ;;  %v1695_v17 = vrot.slane %v2693_v29, %v2214_v13  ;;  %s1766_s27 = sshll.u32 %s1968_s3, 4  ;;  %s1767_s27 = int_to_ptr.vmem [resolvable:$true] %s1766_s27 }
 0x3e7   :  { %v1535_v11 = vadd.f32 %v1531_v56, %v1493_v5  ;;  %v1725_v25 = vrot.slane %v2702_v52, %v2180_v38  ;;  %v1576_v58 = vadd.f32 %v1572_v7, %v1534_v27  ;;  %v1729_v22 = vrot.slane %v2702_v52, %v2217_v14  ;;  %s1928_s28 = scalar_lea.vmem %s1767_s27, 256  ;;  %p1933_p11 = scmp.lt.s32.totalorder %s1767_s27, %s1767_s27 }
 0x3e8   :  { %v2611_v3 = vpop.permute.xlu1 %1584  ;;  %v1574_v2 = vadd.f32 %v1570_v32, %v1532_v63  ;;  %v1579_v62 = vadd.f32 %v1575_v54, %v2540_v6  ;;  %p1929_p10 = scmp.ne.s32.totalorder %s1767_s27, %s1928_s28  ;;  %p1934_p12 = scmp.lt.s32.totalorder %s1928_s28, %s1928_s28 }
 0x3e9   :  { %v1592_v9 = vsel %vm723_vm6, %v2587_v19, %v2611_v3  ;;  %v1577_v30 = vadd.f32 %v1573_v59, %v1535_v11  ;;  %v1580_v42 = vadd.f32 %v1576_v58, %v2542_v18 }
 0x3ea   :  { %v2629_v41 = vpop.permute.xlu0 %1586  ;;  %v1578_v28 = vadd.f32 %v1574_v2, %v2536_v34  ;;  %p1935_p13 = por %p1934_p12, %p1933_p11 }
 0x3eb   :  { %v1591_v23 = vsel %vm723_vm6, %v2611_v3, %v2629_v41  ;;  %v1733_v3 = vrot.slane %v2702_v52, %v2225_v16  ;;  %v1581_v61 = vadd.f32 %v1577_v30, %v2546_v46  ;;  %v1737_v46 = vrot.slane %v2702_v52, %v2214_v13 }
 0x3ec   :  { %v2652_v53 = vpop.permute.xlu1 %1588  ;;  %p1936_p0 = pnand %p1935_p13, %p1929_p10 }
 0x3ed   :  { %v1590_v35 = vsel %vm723_vm6, %v2629_v41, %v2652_v53  ;;  %v1593_v1 = vsel %vm723_vm6, %v2652_v53, %v2587_v19  ;;  %v1616_v41 = vmul.f32 %v1599_v20, %v1592_v9  ;;  %v1617_v19 = vmul.f32 %v1603_v43, %v1591_v23 }
 0x3ee   :  { %v2666_v10 = vpop.permute.xlu0 %1624  ;;  %v1618_v53 = vmul.f32 %v1607_v60, %v1590_v35 }
 0x3ef   :  { %v1620_v36 = vadd.f32 %v1616_v41, %v1578_v28  ;;  %v1621_v29 = vadd.f32 %v1617_v19, %v1579_v62 }
 0x3f0   :  { %v1627_v47 = vpop.permute.xlu1 %1626  ;;  %v1622_v39 = vadd.f32 %v1618_v53, %v1580_v42 }
 0x3f1   :  { %v1634_v40 = vsel %vm767_vm7, %v2666_v10, %v1627_v47 }
 0x3f2   :  { %v1629_v8 = vpop.permute.xlu0 %1628  ;;  %v1658_v60 = vmul.f32 %v1641_v21, %v1634_v40 }
 0x3f3   :  { %v1633_v6 = vsel %vm767_vm7, %v1627_v47, %v1629_v8  ;;  %v1619_v47 = vmul.f32 %v1611_v31, %v1593_v1 }
 0x3f4   :  { %v1631_v57 = vpop.permute.xlu1 %1630  ;;  %v1662_v37 = vadd.f32 %v1658_v60, %v1620_v36 }
 0x3f5   :  { %v1632_v34 = vsel %vm767_vm7, %v1629_v8, %v1631_v57  ;;  %v1635_v20 = vsel %vm767_vm7, %v1631_v57, %v2666_v10  ;;  %v2805_v10 = vrot.slane %v2634_v26, %v2217_v14  ;;  %v1623_v56 = vadd.f32 %v1619_v47, %v1581_v61 }
 0x3f6   :  { %v1667_v24 = vpop.permute.xlu0 %1666  ;;  %v1660_v48 = vmul.f32 %v1649_v50, %v1632_v34  ;;  %v1661_v32 = vmul.f32 %v1653_v49, %v1635_v20 }
 0x3f7   :  { %v1659_v8 = vmul.f32 %v2805_v10, %v1633_v6 }
 0x3f8   :  { %v1669_v0 = vpop.permute.xlu1 %1668  ;;  %v1664_v50 = vadd.f32 %v1660_v48, %v1622_v39  ;;  %v1665_v49 = vadd.f32 %v1661_v32, %v1623_v56 }
 0x3f9   :  { %v1676_v43 = vsel %vm811_vm8, %v1667_v24, %v1669_v0  ;;  %v1663_v63 = vadd.f32 %v1659_v8, %v1621_v29 }
 0x3fa   :  { %v1671_v45 = vpop.permute.xlu0 %1670  ;;  %v1700_v38 = vmul.f32 %v1683_v55, %v1676_v43 }
 0x3fb   :  { %v1675_v16 = vsel %vm811_vm8, %v1669_v0, %v1671_v45 }
 0x3fc   :  { %v1673_v33 = vpop.permute.xlu1 %1672  ;;  %v1701_v21 = vmul.f32 %v1687_v51, %v1675_v16  ;;  %v1704_v59 = vadd.f32 %v1700_v38, %v1662_v37 }
 0x3fd   :  { %v1674_v18 = vsel %vm811_vm8, %v1671_v45, %v1673_v33  ;;  %v1677_v44 = vsel %vm811_vm8, %v1673_v33, %v1667_v24 }
 0x3fe   :  { %v1709_v31 = vpop.permute.xlu0 %1708  ;;  %v1702_v14 = vmul.f32 %v1691_v4, %v1674_v18  ;;  %v1703_v26 = vmul.f32 %v1695_v17, %v1677_v44  ;;  %v1705_v24 = vadd.f32 %v1701_v21, %v1663_v63 }
 0x400   :  { %v1711_v15 = vpop.permute.xlu1 %1710  ;;  %v1706_v2 = vadd.f32 %v1702_v14, %v1664_v50  ;;  %v1707_v51 = vadd.f32 %v1703_v26, %v1665_v49 }
 0x401   :  { %v1718_v57 = vsel %vm855_vm9, %v1709_v31, %v1711_v15 }
 0x402   :  { %v1742_v7 = vmul.f32 %v1725_v25, %v1718_v57  ;;  %v1713_v5 = vpop.permute.xlu0 %1712 }
 0x403   :  { %v1717_v54 = vsel %vm855_vm9, %v1711_v15, %v1713_v5 }
 0x404   :  { %v1743_v55 = vmul.f32 %v1729_v22, %v1717_v54  ;;  %v1715_v27 = vpop.permute.xlu1 %1714  ;;  %v1746_v9 = vadd.f32 %v1742_v7, %v1704_v59 }
 0x405   :  { %v1716_v4 = vsel %vm855_vm9, %v1713_v5, %v1715_v27  ;;  %v1719_v11 = vsel %vm855_vm9, %v1715_v27, %v1709_v31 }
 0x406   :  { %v1747_v0 = vadd.f32 %v1743_v55, %v1705_v24  ;;  %v1744_v13 = vmul.f32 %v1733_v3, %v1716_v4  ;;  %v1745_v52 = vmul.f32 %v1737_v46, %v1719_v11 }
 0x408   :  { %v1748_v17 = vadd.f32 %v1744_v13, %v1706_v2  ;;  %v1749_v25 = vadd.f32 %v1745_v52, %v1707_v51  ;;  %v1754_v58 = vcombine.low %v1746_v9, %v1747_v0 }
 0x40a   :  { %v1755_v23 = vcombine.low %v1748_v17, %v1749_v25  ;;  %1758 = vst [vmem:[#allocation5] sm:$0xff] %v1754_v58 }
 0x40c   :  { %1759 = vst [vmem:[#allocation5 + $0x8] sm:$0xff] %v1755_v23 }
 0x40d   :  { %1939 = shalt.err (!%p1936_p0)
}
 0x40e   :  { %1769 = dma.vmem_to_hbm [thread:$0]  %s1767_s27, 256, %s2794_s7, [#allocation4]  }
 0x40f   :  { %1950 = dma.done.wait [#allocation4], 256  }
 0x410   :  { %1951 = vsyncadd [#allocation4], 4294967040 }
 0x411   :  { %1952 = dma.done.wait [#allocation7], 64  }
 0x412   :  { %1953 = vsyncadd [#allocation7], 4294967232 }
 0x413   :  { %1786 = vsyncpa [#allocation3], 1 }
 0x414   :  { %1787 = vsyncpa [#allocation4], 1 }
 0x415   :  { %1788 = vsyncpa [#allocation7], 1 }

</bundles_post_ra>
